<compile_context>
chip_gen: v7x
topology: tpu7x:2x2x1
jax: 0.10.0
libtpu: 0.0.40
codegen_flags: <defaults>
</compile_context>

<pallas_src>
import jax
import jax.numpy as jnp
from jax.experimental import pallas as pl
from jax.experimental.pallas import tpu as pltpu

BANK_SCALE = 2
BANK_SIZE = 9
IN_EPS = 1e-5          # torch InstanceNorm1d default eps
LRELU_SLOPE = 0.01     # torch nn.LeakyReLU() default negative_slope


# ------------------------------ static layout -------------------------------

def _bank_kernel_sizes():
    return list(range(BANK_SCALE, BANK_SIZE + 1, BANK_SCALE))   # [2, 4, 6, 8]


def _pad_amounts(k):
    if k % 2 == 0:
        return k // 2, k // 2 - 1
    return k // 2, k // 2


def _round_up(x, m):
    return -(-x // m) * m


def _weight_layout(cfg):
    """Row layout of the single packed weight matrix / bias matrix."""
    c_in, c_h, c_out = cfg["c_in"], cfg["c_h"], cfg["c_out"]
    c_bank, K, nb = cfg["c_bank"], cfg["kernel_size"], cfg["n_conv_blocks"]
    bank_ks = _bank_kernel_sizes()
    n_bank = len(bank_ks)
    kb = bank_ks[-1]
    head_cols = _round_up(2 * c_out, 128)       # lane-dense output store

    order, segs = [], {}
    off = 0

    def add(name, rows, cout):
        nonlocal off
        segs[name] = (off, rows, cout)
        order.append(name)
        off += _round_up(rows, 16)              # bf16 sublane-pack alignment

    add("bank", kb * c_in, n_bank * c_bank)     # fused 8-tap conv bank
    add("in_bank", n_bank * c_bank, c_h)        # in_conv_layer, bank part
    add("in_x", c_in, c_h)                      # in_conv_layer, raw-x part
    for l in range(nb):
        add(f"f{l}", K * c_h, c_h)              # first_conv_layers[l]
        add(f"s{l}", K * c_h, c_h)              # second_conv_layers[l]
    add("head", c_h, head_cols)                 # mean_layer || std_layer

    cmax = _round_up(max(c for (_, _, c) in segs.values()), 128)
    return order, segs, off, cmax, head_cols


# --------------------------------- kernel -----------------------------------

def _make_kernel(cfg, T, Bb):
    c_in, c_h = cfg["c_in"], cfg["c_h"]
    c_bank = cfg["c_bank"]
    K = cfg["kernel_size"]
    nb = cfg["n_conv_blocks"]
    subs = cfg["subsample"]
    bank_ks = _bank_kernel_sizes()
    n_bank = len(bank_ks)
    kb = bank_ks[-1]
    order, segs, _, _, head_cols = _weight_layout(cfg)
    brow = {name: i for i, name in enumerate(order)}
    pad_lt, pad_rt = _pad_amounts(K)
    pad_lb, _ = _pad_amounts(kb)
    slope = LRELU_SLOPE if cfg.get("act", "lrelu") == "lrelu" else 0.0

    def _act(v):
        return jnp.where(v >= 0, v, slope * v)

    def _instance_norm(x):
        # InstanceNorm1d(affine=False): per-(sample, channel) over time (f32).
        # Single sweep: mean and mean-of-squares together, v = E[x^2] - m^2.
        m = jnp.mean(x, axis=1, keepdims=True)
        ms = jnp.mean(x * x, axis=1, keepdims=True)
        v = jnp.maximum(ms - m * m, 0.0)
        return (x - m) * jax.lax.rsqrt(v + IN_EPS)

    def kernel(x_ref, w_ref, b_ref, o_ref, pad_sc):
        # Weights / biases are sliced from the packed refs at the use site
        # (no hoisted tile loads -> bounded vreg live ranges).
        def wseg(name, r0, nrows, cout):
            off, _, _ = segs[name]
            return w_ref[off + r0:off + r0 + nrows, 0:cout]

        def bseg(name, cout):
            i = brow[name]
            return b_ref[i:i + 1, 0:cout]

        def conv_taps(read_tap, k, seg_name, cin, cout, L_out):
            # Conv as k accumulated per-tap matmuls (no lane-axis im2col
            # concat -> no relayout when k*cin is not 128-aligned); lhs rows
            # are batched across the Bb samples.
            acc = None
            for dk in range(k):
                lhs = read_tap(dk).reshape(Bb * L_out, cin)
                w_dk = wseg(seg_name, dk * cin, cin, cout)
                p = jnp.dot(lhs.astype(w_dk.dtype), w_dk,
                            preferred_element_type=jnp.float32)
                acc = p if acc is None else acc + p
            return acc + bseg(seg_name, cout)            # (Bb*L_out, cout)

        # ---- conv bank: 4 convs (k=2,4,6,8) fused into one 8-tap conv ------
        nbc = n_bank * c_bank
        bank = _act(conv_taps(lambda dk: x_ref[:, dk:dk + T, :],
                              kb, "bank", c_in, nbc, T))       # (Bb*T, nbc)

        # ---- in_conv (k=1) over concat([bank outs, x]) as a split matmul ---
        # (the raw-x term stays a separate tiny matmul: with raw x DMA'd in,
        #  there is no misaligned lane slice left to remove by folding it
        #  into the bank weight, and folding would reintroduce a 32-offset
        #  lane split of the fused matmul output.)
        x_raw = x_ref[:, pad_lb:pad_lb + T, :].reshape(Bb * T, c_in)
        h = (jnp.dot(bank.astype(w_ref.dtype), wseg("in_bank", 0, nbc, c_h),
                     preferred_element_type=jnp.float32)
             + jnp.dot(x_raw, wseg("in_x", 0, c_in, c_h),
                       preferred_element_type=jnp.float32)
             + bseg("in_bank", c_h))
        out = _act(_instance_norm(h.reshape(Bb, T, c_h)))      # (Bb, T, c_h)
        # TODO(synk): dropout_layer treated as identity (inference path).

        def reflect_to_scratch(val, L):
            # Write reflect-padded `val` (Bb, L, c_h) into pad_sc rows
            # [0, L + K - 1).
            pad_sc[:, pad_lt:pad_lt + L, :] = val
            for j in range(pad_lt):
                pad_sc[:, j:j + 1, :] = val[:, pad_lt - j:pad_lt - j + 1, :]
            for j in range(pad_rt):
                pad_sc[:, pad_lt + L + j:pad_lt + L + j + 1, :] = \
                    val[:, L - 2 - j:L - 1 - j, :]

        def read_patch(dk, L_out, stride):
            if stride > 1:
                return pad_sc[:, pl.ds(dk, L_out, stride=stride), :]
            return pad_sc[:, dk:dk + L_out, :]

        # ---- residual conv blocks -------------------------------------
        L = T
        for l in range(nb):
            s = subs[l]
            Lo = L // s

            # first conv (stride 1) -> norm -> act
            reflect_to_scratch(out, L)
            y = conv_taps(lambda dk: read_patch(dk, L, 1), K, f"f{l}",
                          c_h, c_h, L)
            y = _act(_instance_norm(y.reshape(Bb, L, c_h)))

            # residual path: avg_pool1d read straight from the pad scratch
            # (which still holds reflect-padded `out`) before it is reused.
            if s > 1:
                acc = pad_sc[:, pl.ds(pad_lt, Lo, stride=s), :]
                for j in range(1, s):
                    acc = acc + pad_sc[:, pl.ds(pad_lt + j, Lo, stride=s), :]
                shortcut = acc * (1.0 / s)
                # TODO(synk): ceil_mode partial trailing window not handled;
                # wrapper asserts L % s == 0.
            else:
                shortcut = out

            # second conv (stride s) -> norm -> act; strided patch reads
            # compute only the Lo output rows.
            reflect_to_scratch(y, L)
            y = conv_taps(lambda dk: read_patch(dk, Lo, s), K, f"s{l}",
                          c_h, c_h, Lo)
            y = _act(_instance_norm(y.reshape(Bb, Lo, c_h)))

            out = y + shortcut
            L = Lo

        # ---- fused mean/std head: one matmul, lane-dense packed store ------
        head = jnp.dot(out.reshape(Bb * L, c_h).astype(w_ref.dtype),
                       wseg("head", 0, c_h, head_cols),
                       preferred_element_type=jnp.float32) + bseg("head", head_cols)
        o_ref[...] = head.reshape(Bb, L, head_cols).astype(o_ref.dtype)

    return kernel


# ------------------------------ host wrapper --------------------------------

def _pick_batch_block(B, Tp, T, Lf, c_in, c_h, head_cols, K, W_all, B_all):
    # Per-sample VMEM estimate (double-buffered in/out tiles + reflect-pad
    # scratch + a few live activation slabs), sized against a ~24 MiB budget
    # so the kernel stays under the 32 MiB scoped default and well under
    # v7x's 64 MiB physical VMEM.
    per_sample = (2 * Tp * c_in * 2              # input tile, bf16, 2 bufs
                  + 2 * Lf * head_cols * 4       # output tile, f32, 2 bufs
                  + (T + K - 1) * c_h * 4        # reflect-pad scratch, f32
                  + 8 * T * c_h * 4)             # live activation slabs, f32
    fixed = 2 * (W_all.size * W_all.dtype.itemsize
                 + B_all.size * B_all.dtype.itemsize)
    budget = (24 << 20) - fixed
    cap = int(max(1, min(B, budget // max(per_sample, 1))))
    divs = [d for d in range(1, cap + 1) if B % d == 0]
    bb = max(divs)
    # Prefer an even grid when splitting (v7x dual-TensorCore balance).
    if B // bb > 1 and (B // bb) % 2 == 1:
        even = [d for d in divs if (B // d) % 2 == 0]
        if even:
            bb = max(even)
    return bb


def content_encoder_forward(x_btc, params, cfg, batch_block=None):
    W_all, B_all = params
    B, T, c_in = x_btc.shape
    assert c_in == cfg["c_in"]
    nb, subs = cfg["n_conv_blocks"], cfg["subsample"]
    c_h, c_out = cfg["c_h"], cfg["c_out"]
    K = cfg["kernel_size"]
    bank_ks = _bank_kernel_sizes()
    kb = bank_ks[-1]
    _, _, _, _, head_cols = _weight_layout(cfg)

    # Sequence-length checks (reflect pad + exact pooling windows).
    pad_lb, pad_rb = _pad_amounts(kb)
    assert T > max(pad_lb, pad_rb), "sequence too short for conv-bank reflect pad"
    pad_lk, pad_rk = _pad_amounts(K)
    Lf = T
    for l in range(nb):
        assert Lf > max(pad_lk, pad_rk, 1), "sequence too short for reflect pad"
        assert Lf % subs[l] == 0, "seq length must divide subsample factors"
        Lf //= subs[l]

    # Host-side layout plumbing: only a reflect pad by the bank receptive
    # field (kb - 1 extra rows); the 8-tap bank im2col happens in-kernel.
    xp = jnp.pad(x_btc, ((0, 0), (pad_lb, pad_rb), (0, 0)),
                 mode="reflect").astype(jnp.bfloat16)        # (B, T+kb-1, c_in)
    Tp = T + kb - 1

    if batch_block is None:
        batch_block = _pick_batch_block(B, Tp, T, Lf, c_in, c_h, head_cols, K,
                                        W_all, B_all)
    Bb = batch_block
    assert B % Bb == 0
    grid = (B // Bb,)

    out_shape = jax.ShapeDtypeStruct((B, Lf, head_cols), jnp.float32)
    kernel = _make_kernel(cfg, T, Bb)

    fn = pl.pallas_call(
        kernel,
        out_shape=out_shape,
        grid_spec=pltpu.PrefetchScalarGridSpec(
            num_scalar_prefetch=0,
            grid=grid,
            in_specs=[
                pl.BlockSpec((Bb, Tp, c_in), lambda g: (g, 0, 0)),
                pl.BlockSpec(W_all.shape, lambda g: (0, 0)),
                pl.BlockSpec(B_all.shape, lambda g: (0, 0)),
            ],
            out_specs=pl.BlockSpec((Bb, Lf, head_cols), lambda g: (g, 0, 0)),
            scratch_shapes=[
                pltpu.VMEM((Bb, T + K - 1, c_h), jnp.float32),  # reflect pad
            ],
        ),
        compiler_params=pltpu.CompilerParams(
            dimension_semantics=("parallel",),
            vmem_limit_bytes=32 * 1024 * 1024,
        ),
    )
    packed = fn(xp, W_all, B_all)
    return packed[..., :c_out], packed[..., c_out:2 * c_out]


# ------------------------- deterministic packed params ----------------------

def init_params(key, cfg):
    c_in, c_h, c_out = cfg["c_in"], cfg["c_h"], cfg["c_out"]
    c_bank, K, nb = cfg["c_bank"], cfg["kernel_size"], cfg["n_conv_blocks"]
    bank_ks = _bank_kernel_sizes()
    n_bank = len(bank_ks)
    kb = bank_ks[-1]
    in_ch = n_bank * c_bank + c_in

    order, segs, total_rows, cmax, head_cols = _weight_layout(cfg)
    row_of = {name: i for i, name in enumerate(order)}

    n_convs = n_bank + 1 + 2 * nb + 2
    keys = iter(jax.random.split(key, 2 * n_convs))

    def torch_conv(cin, cout, k):
        # PyTorch Conv1d default init: U(-1/sqrt(cin*k), 1/sqrt(cin*k))
        bound = 1.0 / float(cin * k) ** 0.5
        w = jax.random.uniform(next(keys), (cout, cin, k), jnp.float32, -bound, bound)
        b = jax.random.uniform(next(keys), (cout,), jnp.float32, -bound, bound)
        return w, b

    W = jnp.zeros((total_rows, cmax), jnp.float32)
    Bm = jnp.zeros((len(order), cmax), jnp.float32)

    # conv bank: each k-tap conv embedded (centered) into the fused 8-tap conv
    offb, _, _ = segs["bank"]
    for i, k in enumerate(bank_ks):
        w, b = torch_conv(c_in, c_bank, k)
        shift = kb // 2 - k // 2            # tap offset inside the fused kernel
        for dk in range(k):
            r = offb + (shift + dk) * c_in
            W = W.at[r:r + c_in, i * c_bank:(i + 1) * c_bank].set(w[:, :, dk].T)
        Bm = Bm.at[row_of["bank"], i * c_bank:(i + 1) * c_bank].set(b)

    # in_conv_layer (k=1), split into bank-channel part and raw-x part
    w, b = torch_conv(in_ch, c_h, 1)
    off_ib, _, _ = segs["in_bank"]
    off_ix, _, _ = segs["in_x"]
    W = W.at[off_ib:off_ib + n_bank * c_bank, :c_h].set(w[:, :n_bank * c_bank, 0].T)
    W = W.at[off_ix:off_ix + c_in, :c_h].set(w[:, n_bank * c_bank:, 0].T)
    Bm = Bm.at[row_of["in_bank"], :c_h].set(b)

    # residual conv blocks (per-tap weight rows at dk*c_h)
    for l in range(nb):
        for tag in (f"f{l}", f"s{l}"):
            w, b = torch_conv(c_h, c_h, K)
            o, _, _ = segs[tag]
            for dk in range(K):
                W = W.at[o + dk * c_h:o + (dk + 1) * c_h, :c_h].set(w[:, :, dk].T)
            Bm = Bm.at[row_of[tag], :c_h].set(b)

    # mean / std heads fused into one (c_h, head_cols) weight (zero padded)
    wm, bm = torch_conv(c_h, c_out, 1)
    ws, bs = torch_conv(c_h, c_out, 1)
    oh, _, _ = segs["head"]
    W = W.at[oh:oh + c_h, :c_out].set(wm[:, :, 0].T)
    W = W.at[oh:oh + c_h, c_out:2 * c_out].set(ws[:, :, 0].T)
    Bm = Bm.at[row_of["head"], :c_out].set(bm)
    Bm = Bm.at[row_of["head"], c_out:2 * c_out].set(bs)

    return W.astype(jnp.bfloat16), Bm


# ----------------------------------- main ------------------------------------

if __name__ == "__main__":
    cfg = dict(
        c_in=8, c_h=32, c_out=16, kernel_size=3, c_bank=8,
        n_conv_blocks=2, subsample=(2, 1), act="lrelu", dropout_rate=0.0,
    )
    B, T = 2, 16

    key = jax.random.PRNGKey(0)
    kx, kp = jax.random.split(key)
    # (B, T, C) == PyTorch (B, C, T) transposed (time-major channels-last)
    x = jax.random.normal(kx, (B, T, cfg["c_in"]), jnp.float32)
    params = init_params(kp, cfg)

    mu, sigma = content_encoder_forward(x, params, cfg)
    jax.block_until_ready((mu, sigma))

    expected_T = T // (cfg["subsample"][0] * cfg["subsample"][1])
    assert mu.shape == (B, expected_T, cfg["c_out"])
    assert sigma.shape == (B, expected_T, cfg["c_out"])
    assert jnp.all(jnp.isfinite(mu)) and jnp.all(jnp.isfinite(sigma))
    print("KERNEL_OK")
</pallas_src>

<mosaic_0001>
module attributes {stable_mosaic.version = 11 : i64} {
  func.func @kernel(%arg0: i32, %arg1: memref<2x23x8xbf16, #tpu.memory_space<vmem>>, %arg2: memref<528x128xbf16, #tpu.memory_space<vmem>>, %arg3: memref<8x128xf32, #tpu.memory_space<vmem>>, %arg4: memref<2x8x128xf32, #tpu.memory_space<vmem>>, %arg5: memref<2x18x32xf32, #tpu.memory_space<vmem>>) attributes {dimension_semantics = [#tpu.dimension_semantics<parallel>], iteration_bounds = array<i64: 1>, scalar_prefetch = 0 : i64, scratch_operands = 1 : i64, tpu.core_type = #tpu.core_type<tc>, window_params = [{transform_indices = @transform_0, window_bounds = array<i64: 2, 23, 8>}, {pipeline_mode = #tpu.pipeline_mode<synchronous>, transform_indices = @transform_1, window_bounds = array<i64: 528, 128>}, {pipeline_mode = #tpu.pipeline_mode<synchronous>, transform_indices = @transform_2, window_bounds = array<i64: 8, 128>}, {transform_indices = @transform_3, window_bounds = array<i64: 2, 8, 128>}]} {
    %c0 = arith.constant 0 : index
    %c0_0 = arith.constant 0 : index
    %c0_1 = arith.constant 0 : index
    %0 = vector.load %arg1[%c0, %c0_0, %c0_1] : memref<2x23x8xbf16, #tpu.memory_space<vmem>>, vector<2x16x8xbf16>
    %1 = vector.shape_cast %0 : vector<2x16x8xbf16> to vector<32x8xbf16>
    %c0_2 = arith.constant 0 : index
    %c0_3 = arith.constant 0 : index
    %2 = vector.load %arg2[%c0_2, %c0_3] : memref<528x128xbf16, #tpu.memory_space<vmem>>, vector<8x32xbf16>
    %cst = arith.constant dense<0.000000e+00> : vector<32x32xf32>
    %3 = tpu.matmul %1, %2, %cst {dimension_numbers = #tpu.dot_dimension_numbers<[1], [0], [0], [1], [0, 0, 1, 1], [], []>} : vector<32x8xbf16>, vector<8x32xbf16>, vector<32x32xf32> -> vector<32x32xf32>
    %c0_4 = arith.constant 0 : index
    %c1 = arith.constant 1 : index
    %c0_5 = arith.constant 0 : index
    %4 = vector.load %arg1[%c0_4, %c1, %c0_5] : memref<2x23x8xbf16, #tpu.memory_space<vmem>>, vector<2x16x8xbf16>
    %5 = vector.shape_cast %4 : vector<2x16x8xbf16> to vector<32x8xbf16>
    %c8 = arith.constant 8 : index
    %c0_6 = arith.constant 0 : index
    %6 = vector.load %arg2[%c8, %c0_6] : memref<528x128xbf16, #tpu.memory_space<vmem>>, vector<8x32xbf16>
    %cst_7 = arith.constant dense<0.000000e+00> : vector<32x32xf32>
    %7 = tpu.matmul %5, %6, %cst_7 {dimension_numbers = #tpu.dot_dimension_numbers<[1], [0], [0], [1], [0, 0, 1, 1], [], []>} : vector<32x8xbf16>, vector<8x32xbf16>, vector<32x32xf32> -> vector<32x32xf32>
    %8 = arith.addf %3, %7 : vector<32x32xf32>
    %c0_8 = arith.constant 0 : index
    %c2 = arith.constant 2 : index
    %c0_9 = arith.constant 0 : index
    %9 = vector.load %arg1[%c0_8, %c2, %c0_9] : memref<2x23x8xbf16, #tpu.memory_space<vmem>>, vector<2x16x8xbf16>
    %10 = vector.shape_cast %9 : vector<2x16x8xbf16> to vector<32x8xbf16>
    %c16 = arith.constant 16 : index
    %c0_10 = arith.constant 0 : index
    %11 = vector.load %arg2[%c16, %c0_10] : memref<528x128xbf16, #tpu.memory_space<vmem>>, vector<8x32xbf16>
    %cst_11 = arith.constant dense<0.000000e+00> : vector<32x32xf32>
    %12 = tpu.matmul %10, %11, %cst_11 {dimension_numbers = #tpu.dot_dimension_numbers<[1], [0], [0], [1], [0, 0, 1, 1], [], []>} : vector<32x8xbf16>, vector<8x32xbf16>, vector<32x32xf32> -> vector<32x32xf32>
    %13 = arith.addf %8, %12 : vector<32x32xf32>
    %c0_12 = arith.constant 0 : index
    %c3 = arith.constant 3 : index
    %c0_13 = arith.constant 0 : index
    %14 = vector.load %arg1[%c0_12, %c3, %c0_13] : memref<2x23x8xbf16, #tpu.memory_space<vmem>>, vector<2x16x8xbf16>
    %15 = vector.shape_cast %14 : vector<2x16x8xbf16> to vector<32x8xbf16>
    %c24 = arith.constant 24 : index
    %c0_14 = arith.constant 0 : index
    %16 = vector.load %arg2[%c24, %c0_14] : memref<528x128xbf16, #tpu.memory_space<vmem>>, vector<8x32xbf16>
    %cst_15 = arith.constant dense<0.000000e+00> : vector<32x32xf32>
    %17 = tpu.matmul %15, %16, %cst_15 {dimension_numbers = #tpu.dot_dimension_numbers<[1], [0], [0], [1], [0, 0, 1, 1], [], []>} : vector<32x8xbf16>, vector<8x32xbf16>, vector<32x32xf32> -> vector<32x32xf32>
    %18 = arith.addf %13, %17 : vector<32x32xf32>
    %c0_16 = arith.constant 0 : index
    %c4 = arith.constant 4 : index
    %c0_17 = arith.constant 0 : index
    %19 = vector.load %arg1[%c0_16, %c4, %c0_17] : memref<2x23x8xbf16, #tpu.memory_space<vmem>>, vector<2x16x8xbf16>
    %20 = vector.shape_cast %19 : vector<2x16x8xbf16> to vector<32x8xbf16>
    %c32 = arith.constant 32 : index
    %c0_18 = arith.constant 0 : index
    %21 = vector.load %arg2[%c32, %c0_18] : memref<528x128xbf16, #tpu.memory_space<vmem>>, vector<8x32xbf16>
    %cst_19 = arith.constant dense<0.000000e+00> : vector<32x32xf32>
    %22 = tpu.matmul %20, %21, %cst_19 {dimension_numbers = #tpu.dot_dimension_numbers<[1], [0], [0], [1], [0, 0, 1, 1], [], []>} : vector<32x8xbf16>, vector<8x32xbf16>, vector<32x32xf32> -> vector<32x32xf32>
    %23 = arith.addf %18, %22 : vector<32x32xf32>
    %c0_20 = arith.constant 0 : index
    %c5 = arith.constant 5 : index
    %c0_21 = arith.constant 0 : index
    %24 = vector.load %arg1[%c0_20, %c5, %c0_21] : memref<2x23x8xbf16, #tpu.memory_space<vmem>>, vector<2x16x8xbf16>
    %25 = vector.shape_cast %24 : vector<2x16x8xbf16> to vector<32x8xbf16>
    %c40 = arith.constant 40 : index
    %c0_22 = arith.constant 0 : index
    %26 = vector.load %arg2[%c40, %c0_22] : memref<528x128xbf16, #tpu.memory_space<vmem>>, vector<8x32xbf16>
    %cst_23 = arith.constant dense<0.000000e+00> : vector<32x32xf32>
    %27 = tpu.matmul %25, %26, %cst_23 {dimension_numbers = #tpu.dot_dimension_numbers<[1], [0], [0], [1], [0, 0, 1, 1], [], []>} : vector<32x8xbf16>, vector<8x32xbf16>, vector<32x32xf32> -> vector<32x32xf32>
    %28 = arith.addf %23, %27 : vector<32x32xf32>
    %c0_24 = arith.constant 0 : index
    %c6 = arith.constant 6 : index
    %c0_25 = arith.constant 0 : index
    %29 = vector.load %arg1[%c0_24, %c6, %c0_25] : memref<2x23x8xbf16, #tpu.memory_space<vmem>>, vector<2x16x8xbf16>
    %30 = vector.shape_cast %29 : vector<2x16x8xbf16> to vector<32x8xbf16>
    %c48 = arith.constant 48 : index
    %c0_26 = arith.constant 0 : index
    %31 = vector.load %arg2[%c48, %c0_26] : memref<528x128xbf16, #tpu.memory_space<vmem>>, vector<8x32xbf16>
    %cst_27 = arith.constant dense<0.000000e+00> : vector<32x32xf32>
    %32 = tpu.matmul %30, %31, %cst_27 {dimension_numbers = #tpu.dot_dimension_numbers<[1], [0], [0], [1], [0, 0, 1, 1], [], []>} : vector<32x8xbf16>, vector<8x32xbf16>, vector<32x32xf32> -> vector<32x32xf32>
    %33 = arith.addf %28, %32 : vector<32x32xf32>
    %c0_28 = arith.constant 0 : index
    %c7 = arith.constant 7 : index
    %c0_29 = arith.constant 0 : index
    %34 = vector.load %arg1[%c0_28, %c7, %c0_29] : memref<2x23x8xbf16, #tpu.memory_space<vmem>>, vector<2x16x8xbf16>
    %35 = vector.shape_cast %34 : vector<2x16x8xbf16> to vector<32x8xbf16>
    %c56 = arith.constant 56 : index
    %c0_30 = arith.constant 0 : index
    %36 = vector.load %arg2[%c56, %c0_30] : memref<528x128xbf16, #tpu.memory_space<vmem>>, vector<8x32xbf16>
    %cst_31 = arith.constant dense<0.000000e+00> : vector<32x32xf32>
    %37 = tpu.matmul %35, %36, %cst_31 {dimension_numbers = #tpu.dot_dimension_numbers<[1], [0], [0], [1], [0, 0, 1, 1], [], []>} : vector<32x8xbf16>, vector<8x32xbf16>, vector<32x32xf32> -> vector<32x32xf32>
    %38 = arith.addf %33, %37 : vector<32x32xf32>
    %c0_32 = arith.constant 0 : index
    %c0_33 = arith.constant 0 : index
    %39 = vector.load %arg3[%c0_32, %c0_33] : memref<8x128xf32, #tpu.memory_space<vmem>>, vector<1x32xf32>
    %40 = vector.broadcast %39 : vector<1x32xf32> to vector<32x32xf32>
    %41 = arith.addf %38, %40 : vector<32x32xf32>
    %cst_34 = arith.constant 0.000000e+00 : f32
    %42 = vector.broadcast %cst_34 : f32 to vector<32x32xf32>
    %43 = arith.cmpf oge, %41, %42 : vector<32x32xf32>
    %cst_35 = arith.constant 0.00999999977 : f32
    %44 = vector.broadcast %cst_35 : f32 to vector<32x32xf32>
    %45 = arith.mulf %44, %41 : vector<32x32xf32>
    %46 = arith.select %43, %41, %45 : vector<32x32xi1>, vector<32x32xf32>
    %c0_36 = arith.constant 0 : index
    %c4_37 = arith.constant 4 : index
    %c0_38 = arith.constant 0 : index
    %47 = vector.load %arg1[%c0_36, %c4_37, %c0_38] : memref<2x23x8xbf16, #tpu.memory_space<vmem>>, vector<2x16x8xbf16>
    %48 = vector.shape_cast %47 : vector<2x16x8xbf16> to vector<32x8xbf16>
    %49 = arith.truncf %46 : vector<32x32xf32> to vector<32x32xbf16>
    %c64 = arith.constant 64 : index
    %c0_39 = arith.constant 0 : index
    %50 = vector.load %arg2[%c64, %c0_39] : memref<528x128xbf16, #tpu.memory_space<vmem>>, vector<32x32xbf16>
    %cst_40 = arith.constant dense<0.000000e+00> : vector<32x32xf32>
    %51 = tpu.matmul %49, %50, %cst_40 {dimension_numbers = #tpu.dot_dimension_numbers<[1], [0], [0], [1], [0, 0, 1, 1], [], []>} : vector<32x32xbf16>, vector<32x32xbf16>, vector<32x32xf32> -> vector<32x32xf32>
    %c96 = arith.constant 96 : index
    %c0_41 = arith.constant 0 : index
    %52 = vector.load %arg2[%c96, %c0_41] : memref<528x128xbf16, #tpu.memory_space<vmem>>, vector<8x32xbf16>
    %cst_42 = arith.constant dense<0.000000e+00> : vector<32x32xf32>
    %53 = tpu.matmul %48, %52, %cst_42 {dimension_numbers = #tpu.dot_dimension_numbers<[1], [0], [0], [1], [0, 0, 1, 1], [], []>} : vector<32x8xbf16>, vector<8x32xbf16>, vector<32x32xf32> -> vector<32x32xf32>
    %54 = arith.addf %51, %53 : vector<32x32xf32>
    %c1_43 = arith.constant 1 : index
    %c0_44 = arith.constant 0 : index
    %55 = vector.load %arg3[%c1_43, %c0_44] : memref<8x128xf32, #tpu.memory_space<vmem>>, vector<1x32xf32>
    %56 = vector.broadcast %55 : vector<1x32xf32> to vector<32x32xf32>
    %57 = arith.addf %54, %56 : vector<32x32xf32>
    %58 = vector.shape_cast %57 : vector<32x32xf32> to vector<2x16x32xf32>
    %cst_45 = arith.constant dense<0.000000e+00> : vector<2x32xf32>
    %59 = vector.multi_reduction <add>, %58, %cst_45 [1] : vector<2x16x32xf32> to vector<2x32xf32>
    %60 = vector.shape_cast %59 : vector<2x32xf32> to vector<2x1x32xf32>
    %cst_46 = arith.constant 1.600000e+01 : f32
    %61 = vector.broadcast %cst_46 : f32 to vector<2x1x32xf32>
    %62 = arith.divf %60, %61 : vector<2x1x32xf32>
    %63 = arith.mulf %58, %58 : vector<2x16x32xf32>
    %cst_47 = arith.constant dense<0.000000e+00> : vector<2x32xf32>
    %64 = vector.multi_reduction <add>, %63, %cst_47 [1] : vector<2x16x32xf32> to vector<2x32xf32>
    %65 = vector.shape_cast %64 : vector<2x32xf32> to vector<2x1x32xf32>
    %cst_48 = arith.constant 1.600000e+01 : f32
    %66 = vector.broadcast %cst_48 : f32 to vector<2x1x32xf32>
    %67 = arith.divf %65, %66 : vector<2x1x32xf32>
    %68 = arith.mulf %62, %62 : vector<2x1x32xf32>
    %69 = arith.subf %67, %68 : vector<2x1x32xf32>
    %cst_49 = arith.constant 0.000000e+00 : f32
    %70 = vector.broadcast %cst_49 : f32 to vector<2x1x32xf32>
    %71 = arith.maximumf %69, %70 : vector<2x1x32xf32>
    %72 = vector.broadcast %62 : vector<2x1x32xf32> to vector<2x16x32xf32>
    %73 = arith.subf %58, %72 : vector<2x16x32xf32>
    %cst_50 = arith.constant 9.99999974E-6 : f32
    %74 = vector.broadcast %cst_50 : f32 to vector<2x1x32xf32>
    %75 = arith.addf %71, %74 : vector<2x1x32xf32>
    %76 = math.rsqrt %75 : vector<2x1x32xf32>
    %77 = vector.broadcast %76 : vector<2x1x32xf32> to vector<2x16x32xf32>
    %78 = arith.mulf %73, %77 : vector<2x16x32xf32>
    %cst_51 = arith.constant 0.000000e+00 : f32
    %79 = vector.broadcast %cst_51 : f32 to vector<2x16x32xf32>
    %80 = arith.cmpf oge, %78, %79 : vector<2x16x32xf32>
    %cst_52 = arith.constant 0.00999999977 : f32
    %81 = vector.broadcast %cst_52 : f32 to vector<2x16x32xf32>
    %82 = arith.mulf %81, %78 : vector<2x16x32xf32>
    %83 = arith.select %80, %78, %82 : vector<2x16x32xi1>, vector<2x16x32xf32>
    %c0_53 = arith.constant 0 : index
    %c1_54 = arith.constant 1 : index
    %c0_55 = arith.constant 0 : index
    %84 = vector.load %arg5[%c0_53, %c1_54, %c0_55] : memref<2x18x32xf32, #tpu.memory_space<vmem>>, vector<2x16x32xf32>
    tpu.vector_store %arg5[%c0_53, %c1_54, %c0_55], %83 {strides = array<i32>} : memref<2x18x32xf32, #tpu.memory_space<vmem>>, vector<2x16x32xf32>,
    %85 = vector.extract_strided_slice %83 {offsets = [0, 1, 0], sizes = [2, 1, 32], strides = [1, 1, 1]} : vector<2x16x32xf32> to vector<2x1x32xf32>
    %c0_56 = arith.constant 0 : index
    %c0_57 = arith.constant 0 : index
    %c0_58 = arith.constant 0 : index
    %86 = vector.load %arg5[%c0_56, %c0_57, %c0_58] : memref<2x18x32xf32, #tpu.memory_space<vmem>>, vector<2x1x32xf32>
    tpu.vector_store %arg5[%c0_56, %c0_57, %c0_58], %85 {strides = array<i32>} : memref<2x18x32xf32, #tpu.memory_space<vmem>>, vector<2x1x32xf32>,
    %87 = vector.extract_strided_slice %83 {offsets = [0, 14, 0], sizes = [2, 1, 32], strides = [1, 1, 1]} : vector<2x16x32xf32> to vector<2x1x32xf32>
    %c0_59 = arith.constant 0 : index
    %c17 = arith.constant 17 : index
    %c0_60 = arith.constant 0 : index
    %88 = vector.load %arg5[%c0_59, %c17, %c0_60] : memref<2x18x32xf32, #tpu.memory_space<vmem>>, vector<2x1x32xf32>
    tpu.vector_store %arg5[%c0_59, %c17, %c0_60], %87 {strides = array<i32>} : memref<2x18x32xf32, #tpu.memory_space<vmem>>, vector<2x1x32xf32>,
    %c0_61 = arith.constant 0 : index
    %c0_62 = arith.constant 0 : index
    %c0_63 = arith.constant 0 : index
    %89 = vector.load %arg5[%c0_61, %c0_62, %c0_63] : memref<2x18x32xf32, #tpu.memory_space<vmem>>, vector<2x16x32xf32>
    %90 = vector.shape_cast %89 : vector<2x16x32xf32> to vector<32x32xf32>
    %c112 = arith.constant 112 : index
    %c0_64 = arith.constant 0 : index
    %91 = vector.load %arg2[%c112, %c0_64] : memref<528x128xbf16, #tpu.memory_space<vmem>>, vector<32x32xbf16>
    %92 = arith.truncf %90 : vector<32x32xf32> to vector<32x32xbf16>
    %cst_65 = arith.constant dense<0.000000e+00> : vector<32x32xf32>
    %93 = tpu.matmul %92, %91, %cst_65 {dimension_numbers = #tpu.dot_dimension_numbers<[1], [0], [0], [1], [0, 0, 1, 1], [], []>} : vector<32x32xbf16>, vector<32x32xbf16>, vector<32x32xf32> -> vector<32x32xf32>
    %c0_66 = arith.constant 0 : index
    %c1_67 = arith.constant 1 : index
    %c0_68 = arith.constant 0 : index
    %94 = vector.load %arg5[%c0_66, %c1_67, %c0_68] : memref<2x18x32xf32, #tpu.memory_space<vmem>>, vector<2x16x32xf32>
    %95 = vector.shape_cast %94 : vector<2x16x32xf32> to vector<32x32xf32>
    %c144 = arith.constant 144 : index
    %c0_69 = arith.constant 0 : index
    %96 = vector.load %arg2[%c144, %c0_69] : memref<528x128xbf16, #tpu.memory_space<vmem>>, vector<32x32xbf16>
    %97 = arith.truncf %95 : vector<32x32xf32> to vector<32x32xbf16>
    %cst_70 = arith.constant dense<0.000000e+00> : vector<32x32xf32>
    %98 = tpu.matmul %97, %96, %cst_70 {dimension_numbers = #tpu.dot_dimension_numbers<[1], [0], [0], [1], [0, 0, 1, 1], [], []>} : vector<32x32xbf16>, vector<32x32xbf16>, vector<32x32xf32> -> vector<32x32xf32>
    %99 = arith.addf %93, %98 : vector<32x32xf32>
    %c0_71 = arith.constant 0 : index
    %c2_72 = arith.constant 2 : index
    %c0_73 = arith.constant 0 : index
    %100 = vector.load %arg5[%c0_71, %c2_72, %c0_73] : memref<2x18x32xf32, #tpu.memory_space<vmem>>, vector<2x16x32xf32>
    %101 = vector.shape_cast %100 : vector<2x16x32xf32> to vector<32x32xf32>
    %c176 = arith.constant 176 : index
    %c0_74 = arith.constant 0 : index
    %102 = vector.load %arg2[%c176, %c0_74] : memref<528x128xbf16, #tpu.memory_space<vmem>>, vector<32x32xbf16>
    %103 = arith.truncf %101 : vector<32x32xf32> to vector<32x32xbf16>
    %cst_75 = arith.constant dense<0.000000e+00> : vector<32x32xf32>
    %104 = tpu.matmul %103, %102, %cst_75 {dimension_numbers = #tpu.dot_dimension_numbers<[1], [0], [0], [1], [0, 0, 1, 1], [], []>} : vector<32x32xbf16>, vector<32x32xbf16>, vector<32x32xf32> -> vector<32x32xf32>
    %105 = arith.addf %99, %104 : vector<32x32xf32>
    %c3_76 = arith.constant 3 : index
    %c0_77 = arith.constant 0 : index
    %106 = vector.load %arg3[%c3_76, %c0_77] : memref<8x128xf32, #tpu.memory_space<vmem>>, vector<1x32xf32>
    %107 = vector.broadcast %106 : vector<1x32xf32> to vector<32x32xf32>
    %108 = arith.addf %105, %107 : vector<32x32xf32>
    %109 = vector.shape_cast %108 : vector<32x32xf32> to vector<2x16x32xf32>
    %cst_78 = arith.constant dense<0.000000e+00> : vector<2x32xf32>
    %110 = vector.multi_reduction <add>, %109, %cst_78 [1] : vector<2x16x32xf32> to vector<2x32xf32>
    %111 = vector.shape_cast %110 : vector<2x32xf32> to vector<2x1x32xf32>
    %cst_79 = arith.constant 1.600000e+01 : f32
    %112 = vector.broadcast %cst_79 : f32 to vector<2x1x32xf32>
    %113 = arith.divf %111, %112 : vector<2x1x32xf32>
    %114 = arith.mulf %109, %109 : vector<2x16x32xf32>
    %cst_80 = arith.constant dense<0.000000e+00> : vector<2x32xf32>
    %115 = vector.multi_reduction <add>, %114, %cst_80 [1] : vector<2x16x32xf32> to vector<2x32xf32>
    %116 = vector.shape_cast %115 : vector<2x32xf32> to vector<2x1x32xf32>
    %cst_81 = arith.constant 1.600000e+01 : f32
    %117 = vector.broadcast %cst_81 : f32 to vector<2x1x32xf32>
    %118 = arith.divf %116, %117 : vector<2x1x32xf32>
    %119 = arith.mulf %113, %113 : vector<2x1x32xf32>
    %120 = arith.subf %118, %119 : vector<2x1x32xf32>
    %cst_82 = arith.constant 0.000000e+00 : f32
    %121 = vector.broadcast %cst_82 : f32 to vector<2x1x32xf32>
    %122 = arith.maximumf %120, %121 : vector<2x1x32xf32>
    %123 = vector.broadcast %113 : vector<2x1x32xf32> to vector<2x16x32xf32>
    %124 = arith.subf %109, %123 : vector<2x16x32xf32>
    %cst_83 = arith.constant 9.99999974E-6 : f32
    %125 = vector.broadcast %cst_83 : f32 to vector<2x1x32xf32>
    %126 = arith.addf %122, %125 : vector<2x1x32xf32>
    %127 = math.rsqrt %126 : vector<2x1x32xf32>
    %128 = vector.broadcast %127 : vector<2x1x32xf32> to vector<2x16x32xf32>
    %129 = arith.mulf %124, %128 : vector<2x16x32xf32>
    %cst_84 = arith.constant 0.000000e+00 : f32
    %130 = vector.broadcast %cst_84 : f32 to vector<2x16x32xf32>
    %131 = arith.cmpf oge, %129, %130 : vector<2x16x32xf32>
    %cst_85 = arith.constant 0.00999999977 : f32
    %132 = vector.broadcast %cst_85 : f32 to vector<2x16x32xf32>
    %133 = arith.mulf %132, %129 : vector<2x16x32xf32>
    %134 = arith.select %131, %129, %133 : vector<2x16x32xi1>, vector<2x16x32xf32>
    %c0_86 = arith.constant 0 : index
    %c1_87 = arith.constant 1 : index
    %c0_88 = arith.constant 0 : index
    %135 = tpu.strided_load %arg5[%c0_86, %c1_87, %c0_88] {strides = array<i32: 1, 2, 1>} : memref<2x18x32xf32, #tpu.memory_space<vmem>>, vector<2x8x32xf32>
    %c0_89 = arith.constant 0 : index
    %c2_90 = arith.constant 2 : index
    %c0_91 = arith.constant 0 : index
    %136 = tpu.strided_load %arg5[%c0_89, %c2_90, %c0_91] {strides = array<i32: 1, 2, 1>} : memref<2x18x32xf32, #tpu.memory_space<vmem>>, vector<2x8x32xf32>
    %137 = arith.addf %135, %136 : vector<2x8x32xf32>
    %cst_92 = arith.constant 5.000000e-01 : f32
    %138 = vector.broadcast %cst_92 : f32 to vector<2x8x32xf32>
    %139 = arith.mulf %137, %138 : vector<2x8x32xf32>
    %c0_93 = arith.constant 0 : index
    %c1_94 = arith.constant 1 : index
    %c0_95 = arith.constant 0 : index
    %140 = vector.load %arg5[%c0_93, %c1_94, %c0_95] : memref<2x18x32xf32, #tpu.memory_space<vmem>>, vector<2x16x32xf32>
    tpu.vector_store %arg5[%c0_93, %c1_94, %c0_95], %134 {strides = array<i32>} : memref<2x18x32xf32, #tpu.memory_space<vmem>>, vector<2x16x32xf32>,
    %141 = vector.extract_strided_slice %134 {offsets = [0, 1, 0], sizes = [2, 1, 32], strides = [1, 1, 1]} : vector<2x16x32xf32> to vector<2x1x32xf32>
    %c0_96 = arith.constant 0 : index
    %c0_97 = arith.constant 0 : index
    %c0_98 = arith.constant 0 : index
    %142 = vector.load %arg5[%c0_96, %c0_97, %c0_98] : memref<2x18x32xf32, #tpu.memory_space<vmem>>, vector<2x1x32xf32>
    tpu.vector_store %arg5[%c0_96, %c0_97, %c0_98], %141 {strides = array<i32>} : memref<2x18x32xf32, #tpu.memory_space<vmem>>, vector<2x1x32xf32>,
    %143 = vector.extract_strided_slice %134 {offsets = [0, 14, 0], sizes = [2, 1, 32], strides = [1, 1, 1]} : vector<2x16x32xf32> to vector<2x1x32xf32>
    %c0_99 = arith.constant 0 : index
    %c17_100 = arith.constant 17 : index
    %c0_101 = arith.constant 0 : index
    %144 = vector.load %arg5[%c0_99, %c17_100, %c0_101] : memref<2x18x32xf32, #tpu.memory_space<vmem>>, vector<2x1x32xf32>
    tpu.vector_store %arg5[%c0_99, %c17_100, %c0_101], %143 {strides = array<i32>} : memref<2x18x32xf32, #tpu.memory_space<vmem>>, vector<2x1x32xf32>,
    %c0_102 = arith.constant 0 : index
    %c0_103 = arith.constant 0 : index
    %c0_104 = arith.constant 0 : index
    %145 = tpu.strided_load %arg5[%c0_102, %c0_103, %c0_104] {strides = array<i32: 1, 2, 1>} : memref<2x18x32xf32, #tpu.memory_space<vmem>>, vector<2x8x32xf32>
    %146 = vector.shape_cast %145 : vector<2x8x32xf32> to vector<16x32xf32>
    %c208 = arith.constant 208 : index
    %c0_105 = arith.constant 0 : index
    %147 = vector.load %arg2[%c208, %c0_105] : memref<528x128xbf16, #tpu.memory_space<vmem>>, vector<32x32xbf16>
    %148 = arith.truncf %146 : vector<16x32xf32> to vector<16x32xbf16>
    %cst_106 = arith.constant dense<0.000000e+00> : vector<16x32xf32>
    %149 = tpu.matmul %148, %147, %cst_106 {dimension_numbers = #tpu.dot_dimension_numbers<[1], [0], [0], [1], [0, 0, 1, 1], [], []>} : vector<16x32xbf16>, vector<32x32xbf16>, vector<16x32xf32> -> vector<16x32xf32>
    %c0_107 = arith.constant 0 : index
    %c1_108 = arith.constant 1 : index
    %c0_109 = arith.constant 0 : index
    %150 = tpu.strided_load %arg5[%c0_107, %c1_108, %c0_109] {strides = array<i32: 1, 2, 1>} : memref<2x18x32xf32, #tpu.memory_space<vmem>>, vector<2x8x32xf32>
    %151 = vector.shape_cast %150 : vector<2x8x32xf32> to vector<16x32xf32>
    %c240 = arith.constant 240 : index
    %c0_110 = arith.constant 0 : index
    %152 = vector.load %arg2[%c240, %c0_110] : memref<528x128xbf16, #tpu.memory_space<vmem>>, vector<32x32xbf16>
    %153 = arith.truncf %151 : vector<16x32xf32> to vector<16x32xbf16>
    %cst_111 = arith.constant dense<0.000000e+00> : vector<16x32xf32>
    %154 = tpu.matmul %153, %152, %cst_111 {dimension_numbers = #tpu.dot_dimension_numbers<[1], [0], [0], [1], [0, 0, 1, 1], [], []>} : vector<16x32xbf16>, vector<32x32xbf16>, vector<16x32xf32> -> vector<16x32xf32>
    %155 = arith.addf %149, %154 : vector<16x32xf32>
    %c0_112 = arith.constant 0 : index
    %c2_113 = arith.constant 2 : index
    %c0_114 = arith.constant 0 : index
    %156 = tpu.strided_load %arg5[%c0_112, %c2_113, %c0_114] {strides = array<i32: 1, 2, 1>} : memref<2x18x32xf32, #tpu.memory_space<vmem>>, vector<2x8x32xf32>
    %157 = vector.shape_cast %156 : vector<2x8x32xf32> to vector<16x32xf32>
    %c272 = arith.constant 272 : index
    %c0_115 = arith.constant 0 : index
    %158 = vector.load %arg2[%c272, %c0_115] : memref<528x128xbf16, #tpu.memory_space<vmem>>, vector<32x32xbf16>
    %159 = arith.truncf %157 : vector<16x32xf32> to vector<16x32xbf16>
    %cst_116 = arith.constant dense<0.000000e+00> : vector<16x32xf32>
    %160 = tpu.matmul %159, %158, %cst_116 {dimension_numbers = #tpu.dot_dimension_numbers<[1], [0], [0], [1], [0, 0, 1, 1], [], []>} : vector<16x32xbf16>, vector<32x32xbf16>, vector<16x32xf32> -> vector<16x32xf32>
    %161 = arith.addf %155, %160 : vector<16x32xf32>
    %c4_117 = arith.constant 4 : index
    %c0_118 = arith.constant 0 : index
    %162 = vector.load %arg3[%c4_117, %c0_118] : memref<8x128xf32, #tpu.memory_space<vmem>>, vector<1x32xf32>
    %163 = vector.broadcast %162 : vector<1x32xf32> to vector<16x32xf32>
    %164 = arith.addf %161, %163 : vector<16x32xf32>
    %165 = vector.shape_cast %164 : vector<16x32xf32> to vector<2x8x32xf32>
    %cst_119 = arith.constant dense<0.000000e+00> : vector<2x32xf32>
    %166 = vector.multi_reduction <add>, %165, %cst_119 [1] : vector<2x8x32xf32> to vector<2x32xf32>
    %167 = vector.shape_cast %166 : vector<2x32xf32> to vector<2x1x32xf32>
    %cst_120 = arith.constant 8.000000e+00 : f32
    %168 = vector.broadcast %cst_120 : f32 to vector<2x1x32xf32>
    %169 = arith.divf %167, %168 : vector<2x1x32xf32>
    %170 = arith.mulf %165, %165 : vector<2x8x32xf32>
    %cst_121 = arith.constant dense<0.000000e+00> : vector<2x32xf32>
    %171 = vector.multi_reduction <add>, %170, %cst_121 [1] : vector<2x8x32xf32> to vector<2x32xf32>
    %172 = vector.shape_cast %171 : vector<2x32xf32> to vector<2x1x32xf32>
    %cst_122 = arith.constant 8.000000e+00 : f32
    %173 = vector.broadcast %cst_122 : f32 to vector<2x1x32xf32>
    %174 = arith.divf %172, %173 : vector<2x1x32xf32>
    %175 = arith.mulf %169, %169 : vector<2x1x32xf32>
    %176 = arith.subf %174, %175 : vector<2x1x32xf32>
    %cst_123 = arith.constant 0.000000e+00 : f32
    %177 = vector.broadcast %cst_123 : f32 to vector<2x1x32xf32>
    %178 = arith.maximumf %176, %177 : vector<2x1x32xf32>
    %179 = vector.broadcast %169 : vector<2x1x32xf32> to vector<2x8x32xf32>
    %180 = arith.subf %165, %179 : vector<2x8x32xf32>
    %cst_124 = arith.constant 9.99999974E-6 : f32
    %181 = vector.broadcast %cst_124 : f32 to vector<2x1x32xf32>
    %182 = arith.addf %178, %181 : vector<2x1x32xf32>
    %183 = math.rsqrt %182 : vector<2x1x32xf32>
    %184 = vector.broadcast %183 : vector<2x1x32xf32> to vector<2x8x32xf32>
    %185 = arith.mulf %180, %184 : vector<2x8x32xf32>
    %cst_125 = arith.constant 0.000000e+00 : f32
    %186 = vector.broadcast %cst_125 : f32 to vector<2x8x32xf32>
    %187 = arith.cmpf oge, %185, %186 : vector<2x8x32xf32>
    %cst_126 = arith.constant 0.00999999977 : f32
    %188 = vector.broadcast %cst_126 : f32 to vector<2x8x32xf32>
    %189 = arith.mulf %188, %185 : vector<2x8x32xf32>
    %190 = arith.select %187, %185, %189 : vector<2x8x32xi1>, vector<2x8x32xf32>
    %191 = arith.addf %190, %139 : vector<2x8x32xf32>
    %c0_127 = arith.constant 0 : index
    %c1_128 = arith.constant 1 : index
    %c0_129 = arith.constant 0 : index
    %192 = vector.load %arg5[%c0_127, %c1_128, %c0_129] : memref<2x18x32xf32, #tpu.memory_space<vmem>>, vector<2x8x32xf32>
    tpu.vector_store %arg5[%c0_127, %c1_128, %c0_129], %191 {strides = array<i32>} : memref<2x18x32xf32, #tpu.memory_space<vmem>>, vector<2x8x32xf32>,
    %193 = vector.extract_strided_slice %191 {offsets = [0, 1, 0], sizes = [2, 1, 32], strides = [1, 1, 1]} : vector<2x8x32xf32> to vector<2x1x32xf32>
    %c0_130 = arith.constant 0 : index
    %c0_131 = arith.constant 0 : index
    %c0_132 = arith.constant 0 : index
    %194 = vector.load %arg5[%c0_130, %c0_131, %c0_132] : memref<2x18x32xf32, #tpu.memory_space<vmem>>, vector<2x1x32xf32>
    tpu.vector_store %arg5[%c0_130, %c0_131, %c0_132], %193 {strides = array<i32>} : memref<2x18x32xf32, #tpu.memory_space<vmem>>, vector<2x1x32xf32>,
    %195 = vector.extract_strided_slice %191 {offsets = [0, 6, 0], sizes = [2, 1, 32], strides = [1, 1, 1]} : vector<2x8x32xf32> to vector<2x1x32xf32>
    %c0_133 = arith.constant 0 : index
    %c9 = arith.constant 9 : index
    %c0_134 = arith.constant 0 : index
    %196 = vector.load %arg5[%c0_133, %c9, %c0_134] : memref<2x18x32xf32, #tpu.memory_space<vmem>>, vector<2x1x32xf32>
    tpu.vector_store %arg5[%c0_133, %c9, %c0_134], %195 {strides = array<i32>} : memref<2x18x32xf32, #tpu.memory_space<vmem>>, vector<2x1x32xf32>,
    %c0_135 = arith.constant 0 : index
    %c0_136 = arith.constant 0 : index
    %c0_137 = arith.constant 0 : index
    %197 = vector.load %arg5[%c0_135, %c0_136, %c0_137] : memref<2x18x32xf32, #tpu.memory_space<vmem>>, vector<2x8x32xf32>
    %198 = vector.shape_cast %197 : vector<2x8x32xf32> to vector<16x32xf32>
    %c304 = arith.constant 304 : index
    %c0_138 = arith.constant 0 : index
    %199 = vector.load %arg2[%c304, %c0_138] : memref<528x128xbf16, #tpu.memory_space<vmem>>, vector<32x32xbf16>
    %200 = arith.truncf %198 : vector<16x32xf32> to vector<16x32xbf16>
    %cst_139 = arith.constant dense<0.000000e+00> : vector<16x32xf32>
    %201 = tpu.matmul %200, %199, %cst_139 {dimension_numbers = #tpu.dot_dimension_numbers<[1], [0], [0], [1], [0, 0, 1, 1], [], []>} : vector<16x32xbf16>, vector<32x32xbf16>, vector<16x32xf32> -> vector<16x32xf32>
    %c0_140 = arith.constant 0 : index
    %c1_141 = arith.constant 1 : index
    %c0_142 = arith.constant 0 : index
    %202 = vector.load %arg5[%c0_140, %c1_141, %c0_142] : memref<2x18x32xf32, #tpu.memory_space<vmem>>, vector<2x8x32xf32>
    %203 = vector.shape_cast %202 : vector<2x8x32xf32> to vector<16x32xf32>
    %c336 = arith.constant 336 : index
    %c0_143 = arith.constant 0 : index
    %204 = vector.load %arg2[%c336, %c0_143] : memref<528x128xbf16, #tpu.memory_space<vmem>>, vector<32x32xbf16>
    %205 = arith.truncf %203 : vector<16x32xf32> to vector<16x32xbf16>
    %cst_144 = arith.constant dense<0.000000e+00> : vector<16x32xf32>
    %206 = tpu.matmul %205, %204, %cst_144 {dimension_numbers = #tpu.dot_dimension_numbers<[1], [0], [0], [1], [0, 0, 1, 1], [], []>} : vector<16x32xbf16>, vector<32x32xbf16>, vector<16x32xf32> -> vector<16x32xf32>
    %207 = arith.addf %201, %206 : vector<16x32xf32>
    %c0_145 = arith.constant 0 : index
    %c2_146 = arith.constant 2 : index
    %c0_147 = arith.constant 0 : index
    %208 = vector.load %arg5[%c0_145, %c2_146, %c0_147] : memref<2x18x32xf32, #tpu.memory_space<vmem>>, vector<2x8x32xf32>
    %209 = vector.shape_cast %208 : vector<2x8x32xf32> to vector<16x32xf32>
    %c368 = arith.constant 368 : index
    %c0_148 = arith.constant 0 : index
    %210 = vector.load %arg2[%c368, %c0_148] : memref<528x128xbf16, #tpu.memory_space<vmem>>, vector<32x32xbf16>
    %211 = arith.truncf %209 : vector<16x32xf32> to vector<16x32xbf16>
    %cst_149 = arith.constant dense<0.000000e+00> : vector<16x32xf32>
    %212 = tpu.matmul %211, %210, %cst_149 {dimension_numbers = #tpu.dot_dimension_numbers<[1], [0], [0], [1], [0, 0, 1, 1], [], []>} : vector<16x32xbf16>, vector<32x32xbf16>, vector<16x32xf32> -> vector<16x32xf32>
    %213 = arith.addf %207, %212 : vector<16x32xf32>
    %c5_150 = arith.constant 5 : index
    %c0_151 = arith.constant 0 : index
    %214 = vector.load %arg3[%c5_150, %c0_151] : memref<8x128xf32, #tpu.memory_space<vmem>>, vector<1x32xf32>
    %215 = vector.broadcast %214 : vector<1x32xf32> to vector<16x32xf32>
    %216 = arith.addf %213, %215 : vector<16x32xf32>
    %217 = vector.shape_cast %216 : vector<16x32xf32> to vector<2x8x32xf32>
    %cst_152 = arith.constant dense<0.000000e+00> : vector<2x32xf32>
    %218 = vector.multi_reduction <add>, %217, %cst_152 [1] : vector<2x8x32xf32> to vector<2x32xf32>
    %219 = vector.shape_cast %218 : vector<2x32xf32> to vector<2x1x32xf32>
    %cst_153 = arith.constant 8.000000e+00 : f32
    %220 = vector.broadcast %cst_153 : f32 to vector<2x1x32xf32>
    %221 = arith.divf %219, %220 : vector<2x1x32xf32>
    %222 = arith.mulf %217, %217 : vector<2x8x32xf32>
    %cst_154 = arith.constant dense<0.000000e+00> : vector<2x32xf32>
    %223 = vector.multi_reduction <add>, %222, %cst_154 [1] : vector<2x8x32xf32> to vector<2x32xf32>
    %224 = vector.shape_cast %223 : vector<2x32xf32> to vector<2x1x32xf32>
    %cst_155 = arith.constant 8.000000e+00 : f32
    %225 = vector.broadcast %cst_155 : f32 to vector<2x1x32xf32>
    %226 = arith.divf %224, %225 : vector<2x1x32xf32>
    %227 = arith.mulf %221, %221 : vector<2x1x32xf32>
    %228 = arith.subf %226, %227 : vector<2x1x32xf32>
    %cst_156 = arith.constant 0.000000e+00 : f32
    %229 = vector.broadcast %cst_156 : f32 to vector<2x1x32xf32>
    %230 = arith.maximumf %228, %229 : vector<2x1x32xf32>
    %231 = vector.broadcast %221 : vector<2x1x32xf32> to vector<2x8x32xf32>
    %232 = arith.subf %217, %231 : vector<2x8x32xf32>
    %cst_157 = arith.constant 9.99999974E-6 : f32
    %233 = vector.broadcast %cst_157 : f32 to vector<2x1x32xf32>
    %234 = arith.addf %230, %233 : vector<2x1x32xf32>
    %235 = math.rsqrt %234 : vector<2x1x32xf32>
    %236 = vector.broadcast %235 : vector<2x1x32xf32> to vector<2x8x32xf32>
    %237 = arith.mulf %232, %236 : vector<2x8x32xf32>
    %cst_158 = arith.constant 0.000000e+00 : f32
    %238 = vector.broadcast %cst_158 : f32 to vector<2x8x32xf32>
    %239 = arith.cmpf oge, %237, %238 : vector<2x8x32xf32>
    %cst_159 = arith.constant 0.00999999977 : f32
    %240 = vector.broadcast %cst_159 : f32 to vector<2x8x32xf32>
    %241 = arith.mulf %240, %237 : vector<2x8x32xf32>
    %242 = arith.select %239, %237, %241 : vector<2x8x32xi1>, vector<2x8x32xf32>
    %c0_160 = arith.constant 0 : index
    %c1_161 = arith.constant 1 : index
    %c0_162 = arith.constant 0 : index
    %243 = vector.load %arg5[%c0_160, %c1_161, %c0_162] : memref<2x18x32xf32, #tpu.memory_space<vmem>>, vector<2x8x32xf32>
    tpu.vector_store %arg5[%c0_160, %c1_161, %c0_162], %242 {strides = array<i32>} : memref<2x18x32xf32, #tpu.memory_space<vmem>>, vector<2x8x32xf32>,
    %244 = vector.extract_strided_slice %242 {offsets = [0, 1, 0], sizes = [2, 1, 32], strides = [1, 1, 1]} : vector<2x8x32xf32> to vector<2x1x32xf32>
    %c0_163 = arith.constant 0 : index
    %c0_164 = arith.constant 0 : index
    %c0_165 = arith.constant 0 : index
    %245 = vector.load %arg5[%c0_163, %c0_164, %c0_165] : memref<2x18x32xf32, #tpu.memory_space<vmem>>, vector<2x1x32xf32>
    tpu.vector_store %arg5[%c0_163, %c0_164, %c0_165], %244 {strides = array<i32>} : memref<2x18x32xf32, #tpu.memory_space<vmem>>, vector<2x1x32xf32>,
    %246 = vector.extract_strided_slice %242 {offsets = [0, 6, 0], sizes = [2, 1, 32], strides = [1, 1, 1]} : vector<2x8x32xf32> to vector<2x1x32xf32>
    %c0_166 = arith.constant 0 : index
    %c9_167 = arith.constant 9 : index
    %c0_168 = arith.constant 0 : index
    %247 = vector.load %arg5[%c0_166, %c9_167, %c0_168] : memref<2x18x32xf32, #tpu.memory_space<vmem>>, vector<2x1x32xf32>
    tpu.vector_store %arg5[%c0_166, %c9_167, %c0_168], %246 {strides = array<i32>} : memref<2x18x32xf32, #tpu.memory_space<vmem>>, vector<2x1x32xf32>,
    %c0_169 = arith.constant 0 : index
    %c0_170 = arith.constant 0 : index
    %c0_171 = arith.constant 0 : index
    %248 = vector.load %arg5[%c0_169, %c0_170, %c0_171] : memref<2x18x32xf32, #tpu.memory_space<vmem>>, vector<2x8x32xf32>
    %249 = vector.shape_cast %248 : vector<2x8x32xf32> to vector<16x32xf32>
    %c400 = arith.constant 400 : index
    %c0_172 = arith.constant 0 : index
    %250 = vector.load %arg2[%c400, %c0_172] : memref<528x128xbf16, #tpu.memory_space<vmem>>, vector<32x32xbf16>
    %251 = arith.truncf %249 : vector<16x32xf32> to vector<16x32xbf16>
    %cst_173 = arith.constant dense<0.000000e+00> : vector<16x32xf32>
    %252 = tpu.matmul %251, %250, %cst_173 {dimension_numbers = #tpu.dot_dimension_numbers<[1], [0], [0], [1], [0, 0, 1, 1], [], []>} : vector<16x32xbf16>, vector<32x32xbf16>, vector<16x32xf32> -> vector<16x32xf32>
    %c0_174 = arith.constant 0 : index
    %c1_175 = arith.constant 1 : index
    %c0_176 = arith.constant 0 : index
    %253 = vector.load %arg5[%c0_174, %c1_175, %c0_176] : memref<2x18x32xf32, #tpu.memory_space<vmem>>, vector<2x8x32xf32>
    %254 = vector.shape_cast %253 : vector<2x8x32xf32> to vector<16x32xf32>
    %c432 = arith.constant 432 : index
    %c0_177 = arith.constant 0 : index
    %255 = vector.load %arg2[%c432, %c0_177] : memref<528x128xbf16, #tpu.memory_space<vmem>>, vector<32x32xbf16>
    %256 = arith.truncf %254 : vector<16x32xf32> to vector<16x32xbf16>
    %cst_178 = arith.constant dense<0.000000e+00> : vector<16x32xf32>
    %257 = tpu.matmul %256, %255, %cst_178 {dimension_numbers = #tpu.dot_dimension_numbers<[1], [0], [0], [1], [0, 0, 1, 1], [], []>} : vector<16x32xbf16>, vector<32x32xbf16>, vector<16x32xf32> -> vector<16x32xf32>
    %258 = arith.addf %252, %257 : vector<16x32xf32>
    %c0_179 = arith.constant 0 : index
    %c2_180 = arith.constant 2 : index
    %c0_181 = arith.constant 0 : index
    %259 = vector.load %arg5[%c0_179, %c2_180, %c0_181] : memref<2x18x32xf32, #tpu.memory_space<vmem>>, vector<2x8x32xf32>
    %260 = vector.shape_cast %259 : vector<2x8x32xf32> to vector<16x32xf32>
    %c464 = arith.constant 464 : index
    %c0_182 = arith.constant 0 : index
    %261 = vector.load %arg2[%c464, %c0_182] : memref<528x128xbf16, #tpu.memory_space<vmem>>, vector<32x32xbf16>
    %262 = arith.truncf %260 : vector<16x32xf32> to vector<16x32xbf16>
    %cst_183 = arith.constant dense<0.000000e+00> : vector<16x32xf32>
    %263 = tpu.matmul %262, %261, %cst_183 {dimension_numbers = #tpu.dot_dimension_numbers<[1], [0], [0], [1], [0, 0, 1, 1], [], []>} : vector<16x32xbf16>, vector<32x32xbf16>, vector<16x32xf32> -> vector<16x32xf32>
    %264 = arith.addf %258, %263 : vector<16x32xf32>
    %c6_184 = arith.constant 6 : index
    %c0_185 = arith.constant 0 : index
    %265 = vector.load %arg3[%c6_184, %c0_185] : memref<8x128xf32, #tpu.memory_space<vmem>>, vector<1x32xf32>
    %266 = vector.broadcast %265 : vector<1x32xf32> to vector<16x32xf32>
    %267 = arith.addf %264, %266 : vector<16x32xf32>
    %268 = vector.shape_cast %267 : vector<16x32xf32> to vector<2x8x32xf32>
    %cst_186 = arith.constant dense<0.000000e+00> : vector<2x32xf32>
    %269 = vector.multi_reduction <add>, %268, %cst_186 [1] : vector<2x8x32xf32> to vector<2x32xf32>
    %270 = vector.shape_cast %269 : vector<2x32xf32> to vector<2x1x32xf32>
    %cst_187 = arith.constant 8.000000e+00 : f32
    %271 = vector.broadcast %cst_187 : f32 to vector<2x1x32xf32>
    %272 = arith.divf %270, %271 : vector<2x1x32xf32>
    %273 = arith.mulf %268, %268 : vector<2x8x32xf32>
    %cst_188 = arith.constant dense<0.000000e+00> : vector<2x32xf32>
    %274 = vector.multi_reduction <add>, %273, %cst_188 [1] : vector<2x8x32xf32> to vector<2x32xf32>
    %275 = vector.shape_cast %274 : vector<2x32xf32> to vector<2x1x32xf32>
    %cst_189 = arith.constant 8.000000e+00 : f32
    %276 = vector.broadcast %cst_189 : f32 to vector<2x1x32xf32>
    %277 = arith.divf %275, %276 : vector<2x1x32xf32>
    %278 = arith.mulf %272, %272 : vector<2x1x32xf32>
    %279 = arith.subf %277, %278 : vector<2x1x32xf32>
    %cst_190 = arith.constant 0.000000e+00 : f32
    %280 = vector.broadcast %cst_190 : f32 to vector<2x1x32xf32>
    %281 = arith.maximumf %279, %280 : vector<2x1x32xf32>
    %282 = vector.broadcast %272 : vector<2x1x32xf32> to vector<2x8x32xf32>
    %283 = arith.subf %268, %282 : vector<2x8x32xf32>
    %cst_191 = arith.constant 9.99999974E-6 : f32
    %284 = vector.broadcast %cst_191 : f32 to vector<2x1x32xf32>
    %285 = arith.addf %281, %284 : vector<2x1x32xf32>
    %286 = math.rsqrt %285 : vector<2x1x32xf32>
    %287 = vector.broadcast %286 : vector<2x1x32xf32> to vector<2x8x32xf32>
    %288 = arith.mulf %283, %287 : vector<2x8x32xf32>
    %cst_192 = arith.constant 0.000000e+00 : f32
    %289 = vector.broadcast %cst_192 : f32 to vector<2x8x32xf32>
    %290 = arith.cmpf oge, %288, %289 : vector<2x8x32xf32>
    %cst_193 = arith.constant 0.00999999977 : f32
    %291 = vector.broadcast %cst_193 : f32 to vector<2x8x32xf32>
    %292 = arith.mulf %291, %288 : vector<2x8x32xf32>
    %293 = arith.select %290, %288, %292 : vector<2x8x32xi1>, vector<2x8x32xf32>
    %294 = arith.addf %293, %191 : vector<2x8x32xf32>
    %295 = vector.shape_cast %294 : vector<2x8x32xf32> to vector<16x32xf32>
    %296 = arith.truncf %295 : vector<16x32xf32> to vector<16x32xbf16>
    %c496 = arith.constant 496 : index
    %c0_194 = arith.constant 0 : index
    %297 = vector.load %arg2[%c496, %c0_194] : memref<528x128xbf16, #tpu.memory_space<vmem>>, vector<32x128xbf16>
    %cst_195 = arith.constant dense<0.000000e+00> : vector<16x128xf32>
    %298 = tpu.matmul %296, %297, %cst_195 {dimension_numbers = #tpu.dot_dimension_numbers<[1], [0], [0], [1], [0, 0, 1, 1], [], []>} : vector<16x32xbf16>, vector<32x128xbf16>, vector<16x128xf32> -> vector<16x128xf32>
    %c7_196 = arith.constant 7 : index
    %c0_197 = arith.constant 0 : index
    %299 = vector.load %arg3[%c7_196, %c0_197] : memref<8x128xf32, #tpu.memory_space<vmem>>, vector<1x128xf32>
    %300 = vector.broadcast %299 : vector<1x128xf32> to vector<16x128xf32>
    %301 = arith.addf %298, %300 : vector<16x128xf32>
    %302 = vector.shape_cast %301 : vector<16x128xf32> to vector<2x8x128xf32>
    %c0_198 = arith.constant 0 : index
    %c0_199 = arith.constant 0 : index
    %c0_200 = arith.constant 0 : index
    %303 = vector.load %arg4[%c0_198, %c0_199, %c0_200] : memref<2x8x128xf32, #tpu.memory_space<vmem>>, vector<2x8x128xf32>
    tpu.vector_store %arg4[%c0_198, %c0_199, %c0_200], %302 {strides = array<i32>} : memref<2x8x128xf32, #tpu.memory_space<vmem>>, vector<2x8x128xf32>,
    return
  }
  func.func @transform_0(%arg0: i32) -> (i32, i32, i32) {
    %c0_i32 = arith.constant 0 : i32
    %c0_i32_0 = arith.constant 0 : i32
    %c0_i32_1 = arith.constant 0 : i32
    return %arg0, %c0_i32, %c0_i32_0 : i32, i32, i32
  }
  func.func @transform_1(%arg0: i32) -> (i32, i32) {
    %c0_i32 = arith.constant 0 : i32
    %c0_i32_0 = arith.constant 0 : i32
    %c0_i32_1 = arith.constant 0 : i32
    return %c0_i32, %c0_i32_0 : i32, i32
  }
  func.func @transform_2(%arg0: i32) -> (i32, i32) {
    %c0_i32 = arith.constant 0 : i32
    %c0_i32_0 = arith.constant 0 : i32
    %c0_i32_1 = arith.constant 0 : i32
    return %c0_i32, %c0_i32_0 : i32, i32
  }
  func.func @transform_3(%arg0: i32) -> (i32, i32, i32) {
    %c0_i32 = arith.constant 0 : i32
    %c0_i32_0 = arith.constant 0 : i32
    %c0_i32_1 = arith.constant 0 : i32
    return %arg0, %c0_i32, %c0_i32_0 : i32, i32, i32
  }
}

</mosaic_0001>

<bundles_post_ra>
// kernel: tpu_custom_call.1
= control target key start
LH: loop header
LB: loop body
LE: loop exit
PB: predicated region body
PF: predicated region fallthrough
CT: control target
= control target key end

     0   :  { %8 = vsyncpa [#allocation4], 0  ;;  %s3330_s0 = inlined_call_operand.vmem [shape: bf16[2,23,8], index: 0, kind: input, shape index: {}]   ;;  %s3331_s1 = inlined_call_operand.hbm [shape: bf16[528,128], index: 1, kind: input, shape index: {}]   ;;  %s3332_s2 = inlined_call_operand.vmem [shape: f32[8,128], index: 2, kind: input, shape index: {}]   ;;  %s3333_s3 = inlined_call_operand.hbm [shape: f32[2,8,128], index: 3, kind: output, shape index: {}]  }
   0x1   :  { %9 = vsyncpa [#allocation5], 0  ;;  %s2775_s12 = smov [#allocation3]   ;;  %s2727_s16 = scalar_lea.hbm %s3331_s1, 4224 }
   0x2   :  { %s17_s13 = sshll.u32 %s2775_s12, 4  ;;  %p2728_p0 = scmp.ne.s32.totalorder %s3331_s1, %s2727_s16  ;;  %s18_s13 = int_to_ptr.vmem [resolvable:$true] %s17_s13 }
   0x3   :  { %p2731_p1 = scmp.lt.u32.totalorder %s2727_s16, %s3331_s1 }
   0x5   :  { %p2733_p2 = pnand %p2731_p1, %p2728_p0 }
   0x7   :  { %2736 = shalt.err (!%p2733_p2)
}
   0x8   :  { %s2737_s21 = scalar_lea.vmem %s18_s13, 4224  ;;  %p2742_p4 = scmp.lt.s32.totalorder %s18_s13, %s18_s13 }
   0x9   :  { %p2738_p3 = scmp.ne.s32.totalorder %s18_s13, %s2737_s21  ;;  %p2743_p5 = scmp.lt.s32.totalorder %s2737_s21, %s2737_s21 }
   0xb   :  { %p2744_p6 = por %p2743_p5, %p2742_p4 }
   0xd   :  { %p2745_p7 = pnand %p2744_p6, %p2738_p3 }
   0xf   :  { %2748 = shalt.err (!%p2745_p7)
}
  0x10   :  { %s2776_s22 = smov 64   ;;  %s2777_s23 = smov 4  }
  0x11   :  { %23 = dma.hbm_to_vmem [thread:$0]  %s3331_s1, 4224, %s18_s13, [#allocation4], %s2776_s22, %s2776_s22, %s2777_s23  }
  0x12   :  { %2771 = dma.done.wait [#allocation4], 4224  }
  0x13   :  { %2772 = vsyncadd [#allocation4], 4294963072  ;;  %vm102_vm0 = vcmask 1043456   ;;  %vm37_vm1 = vsmask.f32 3328  ;;  %vm95_vm4 = vcmask 64512  }
  0x14   :  { %v88_v0 = vld [vmem:[#allocation3 + $0x4] sm:$0xf]  ;;  %v2818_v1 = vld [vmem:[%s3330_s0] sm:$0xf]  ;;  %v2823_v2 = vld [vmem:[%s3330_s0 + $0x4] sm:$0xf] }
  0x15   :  { %2660 = vmatprep.subr.msk.bf16.mxu0 %vm102_vm0, %v88_v0  ;;  %v104_v3 = vsel %vm102_vm0, %v88_v0, 0  ;;  %v2830_v4 = vld [vmem:[%s3330_s0 + $0x8] sm:$0x1]  ;;  %v41_v5 = vshrl.u32 %v2818_v1, 16  ;;  %v44_v6 = vshll.u32 %v2818_v1, 16  ;;  %v2835_v7 = vshll.u32 %v2823_v2, 16 }
  0x16   :  { %2455 = vmatpush3.bf16.msra.mxu0 %v104_v3  ;;  %vm38_vm2 = vsmask.f32 7440  ;;  %v2838_v8 = vshrl.u32 %v2823_v2, 16  ;;  %v60_v9 = vshll.u32 %v2830_v4, 16  ;;  %v34_v10 = vld [vmem:[#allocation3] sm:$0xf]  ;;  %v2290_v44 = vcombine.low %v2818_v1, %v2823_v2 }
  0x17   :  { %v43_v11 = vrot.slane %v41_v5, 4  ;;  %v46_v12 = vrot.slane %v44_v6, 5  ;;  %v52_v13 = vrot.slane %v2835_v7, 5  ;;  %2661 = vmatprep.subr.msk.bf16.mxu0 %vm102_vm0, %v34_v10  ;;  %v2846_v14 = vld [vmem:[%s3330_s0 + $0xc] sm:$0xf]  ;;  %vm2866_vm3 = vmor %vm37_vm1, %vm38_vm2  ;;  %v234_v42 = vrot.slane %v2823_v2, 5 }
  0x18   :  { %v56_v15 = vrot.slane %v2838_v8, 4  ;;  %v2852_v16 = vld [vmem:[%s3330_s0 + $0x10] sm:$0xf]  ;;  %v2857_v17 = vld [vmem:[%s3330_s0 + $0x14] sm:$0x1]  ;;  %v65_v19 = vshrl.u32 %v2846_v14, 16 }
  0x19   :  { %v47_v18 = vor.u32 %v46_v12, %v43_v11  ;;  %v68_v20 = vshll.u32 %v2846_v14, 16  ;;  %v2862_v21 = vshll.u32 %v2852_v16, 16  ;;  %v62_v24 = vrot.slane %v60_v9, 5  ;;  %v223_v45 = vld [vmem:[%s3330_s0] sm:$0xe]  ;;  %s2780_s19 = smov [#allocation6]  }
  0x1a   :  { %v57_v23 = vor.u32 %v56_v15, %v52_v13  ;;  %v2871_v25 = vshrl.u32 %v2852_v16, 16  ;;  %v84_v26 = vshll.u32 %v2857_v17, 16  ;;  %v67_v28 = vrot.slane %v65_v19, 4  ;;  %v246_v48 = vld [vmem:[#allocation3 + $0x8] sm:$0xf]  ;;  %s2274_s20 = sshll.u32 %s2780_s19, 4  ;;  %s2275_s20 = int_to_ptr.vmem [resolvable:$true] %s2274_s20 }
  0x1b   :  { %v48_v27 = vrot.slane %v47_v18, 4  ;;  %v70_v29 = vrot.slane %v68_v20, 5  ;;  %v76_v30 = vrot.slane %v2862_v21, 5  ;;  %v172_v47 = vsel %vm102_vm0, %v34_v10, 0  ;;  %v2900_v56 = vld [vmem:[#allocation3 + $0x30] sm:$0xf]  ;;  %p2754_p9 = scmp.lt.s32.totalorder %s2275_s20, %s2275_s20 }
  0x1c   :  { %v58_v31 = vrot.slane %v57_v23, 4  ;;  %v80_v32 = vrot.slane %v2871_v25, 4  ;;  %v86_v37 = vrot.slane %v84_v26, 5  ;;  %vm229_vm5 = vcmask 1042432   ;;  %v315_v57 = vld [vmem:[%s3330_s0 + $0x8] sm:$0x3]  ;;  %2668 = vmatprep.subr.msk.bf16.mxu1 %vm102_vm0, %v2900_v56 }
  0x1d   :  { %v53_v33 = vsel %vm2866_vm3, %v48_v27, %v52_v13  ;;  %v71_v34 = vor.u32 %v70_v29, %v67_v28  ;;  %vm230_vm6 = vcmask 1046532   ;;  %v237_v49 = vrot.slane %v2830_v4, 5  ;;  %v2909_v58 = vld [vmem:[%s3330_s0] sm:$0xc]  ;;  %v224_v59 = vld [vmem:[%s3330_s0 + $0xc] sm:$0xe] }
  0x1e   :  { %v63_v35 = vsel %vm2866_vm3, %v58_v31, %v62_v24  ;;  %v81_v36 = vor.u32 %v80_v32, %v76_v30  ;;  %v2294_v50 = vrot.slane %v223_v45, 9  ;;  %v236_v51 = vrot.slane %v234_v42, 4  ;;  %vm2896_vm7 = vmor %vm229_vm5, %vm230_vm6  ;;  %v366_v23 = vld [vmem:[#allocation3 + $0xc] sm:$0xf]  ;;  %v2937_v27 = vld [vmem:[%s3330_s0 + $0x14] sm:$0x3] }
  0x1f   :  { %v2286_v38 = vcombine.low %v53_v33, %v63_v35  ;;  %v72_v39 = vrot.slane %v71_v34, 4  ;;  %v321_v52 = vshrl.u32 %v223_v45, 16  ;;  %v244_v53 = vrot.slane %v2857_v17, 5  ;;  %s2749_s21 = scalar_lea.vmem %s2275_s20, 256 }
  0x20   :  { %v82_v40 = vrot.slane %v81_v36, 4  ;;  %v324_v55 = vshll.u32 %v223_v45, 16  ;;  %vm441_vm8 = vcmask 1041408   ;;  %vm442_vm9 = vcmask 1045508   ;;  %p2750_p8 = scmp.ne.s32.totalorder %s2275_s20, %s2749_s21  ;;  %p2755_p10 = scmp.lt.s32.totalorder %s2749_s21, %s2749_s21 }
  0x21   :  { %2456 = vmatprep.mubr.msk.bf16.mxu0 %vm95_vm4, %v2286_v38  ;;  %v77_v41 = vsel %vm2866_vm3, %v72_v39, %v76_v30  ;;  %v235_v60 = vsel %vm2896_vm7, %v2294_v50, %v234_v42  ;;  %v238_v61 = vsel %vm2896_vm7, %v236_v51, %v237_v49  ;;  %v241_v62 = vrot.slane %v2852_v16, 5  ;;  %vm2926_vm10 = vmor %vm441_vm8, %vm442_vm9  ;;  %v458_v38 = vld [vmem:[#allocation3 + $0x10] sm:$0xf] }
  0x22   :  { %v87_v43 = vsel %vm2866_vm3, %v82_v40, %v86_v37  ;;  %v323_v63 = vrot.slane %v321_v52, 5  ;;  %v326_v0 = vrot.slane %v324_v55, 6  ;;  %v329_v1 = vrot.slane %v2838_v8, 5  ;;  %v2977_v52 = vld [vmem:[%s3330_s0 + $0x8] sm:$0x7]  ;;  %p2756_p11 = por %p2755_p10, %p2754_p9 }
  0x23   :  { %v2287_v46 = vcombine.low %v77_v41, %v87_v43  ;;  %v335_v3 = vshrl.u32 %v315_v57, 16  ;;  %v2304_v4 = vrot.slane %v2909_v58, 10  ;;  %v330_v5 = vrot.slane %v2835_v7, 6 }
  0x24   :  { %v338_v6 = vshll.u32 %v315_v57, 16  ;;  %v446_v10 = vrot.slane %v2823_v2, 6  ;;  %v449_v11 = vrot.slane %v315_v57, 6  ;;  %v260_v12 = vsel %vm102_vm0, %v246_v48, 0  ;;  %p2757_p12 = pnand %p2756_p11, %p2750_p8 }
  0x25   :  { %2457 = vmatmul.mubr.msk.bf16.vlgmr.msra.gmra.mrb[0].mxu0 %vm95_vm4, %v2287_v46  ;;  %v2295_v13 = vrot.slane %v224_v59, 9  ;;  %v344_v15 = vshrl.u32 %v224_v59, 16  ;;  %v347_v17 = vshll.u32 %v224_v59, 16  ;;  %v2291_v18 = vcombine.low %v2846_v14, %v2852_v16 }
  0x26   :  { %2461 = vmatpush3.bf16.msra.mxu0 %v172_v47  ;;  %2462 = vmatprep.mubr.msk.bf16.mxu0 %vm95_vm4, %v2290_v44  ;;  %v2296_v19 = vcombine.low %v235_v60, %v238_v61  ;;  %v243_v20 = vrot.slane %v241_v62, 4  ;;  %v448_v22 = vrot.slane %v446_v10, 4  ;;  %v327_v24 = vor.u32 %v326_v0, %v323_v63  ;;  %v2969_v47 = vld [vmem:[%s3330_s0 + $0xc] sm:$0xc]  ;;  %v739_v60 = vld [vmem:[%s3330_s0 + $0x8] sm:$0xf] }
  0x27   :  { %2662 = vmatprep.subr.msk.bf16.mxu0 %vm102_vm0, %v246_v48  ;;  %v337_v26 = vrot.slane %v335_v3, 5  ;;  %v352_v28 = vrot.slane %v2871_v25, 5  ;;  %v447_v29 = vsel %vm2926_vm10, %v2304_v4, %v446_v10  ;;  %v331_v30 = vor.u32 %v330_v5, %v329_v1  ;;  %v2995_v0 = vld [vmem:[%s3330_s0] sm:$0x8] }
  0x28   :  { %v340_v31 = vrot.slane %v338_v6, 6  ;;  %v353_v14 = vrot.slane %v2862_v21, 6  ;;  %v450_v32 = vsel %vm2926_vm10, %v448_v22, %v449_v11  ;;  %v346_v33 = vrot.slane %v344_v15, 5 }
  0x29   :  { %v349_v34 = vrot.slane %v347_v17, 6  ;;  %vm317_vm11 = vsmask.f32 2304  ;;  %vm318_vm12 = vsmask.f32 6416  ;;  %v2946_v35 = vcombine.low %v447_v29, %v450_v32 }
  0x2a   :  { %v242_v36 = vsel %vm2896_vm7, %v2295_v13, %v241_v62  ;;  %v245_v37 = vsel %vm2896_vm7, %v243_v20, %v244_v53  ;;  %vm741_vm13 = vsmask.f32 256  ;;  %vm742_vm14 = vsmask.f32 4368  ;;  %vm2959_vm15 = vmor %vm317_vm11, %vm318_vm12  ;;  %v3010_v17 = vld [vmem:[%s3330_s0 + $0xc] sm:$0x8] }
  0x2b   :  { %v328_v39 = vrot.slane %v327_v24, 4  ;;  %v333_v40 = vrot.slane %v331_v30, 4  ;;  %v341_v41 = vor.u32 %v340_v31, %v337_v26  ;;  %v358_v42 = vshrl.u32 %v2937_v27, 16  ;;  %2504 = vmatprep.mubr.msk.bf16.mxu1 %vm95_vm4, %v2946_v35  ;;  %v2679_v20 = vld [vmem:[#allocation3 + $0x20] sm:$0xff]   ;;  %vm3018_vm1 = vmor %vm741_vm13, %vm742_vm14 }
  0x2c   :  { %v350_v44 = vor.u32 %v349_v34, %v346_v33  ;;  %v2963_v45 = vor.u32 %v353_v14, %v352_v28  ;;  %v361_v46 = vshll.u32 %v2937_v27, 16  ;;  %v453_v48 = vrot.slane %v2852_v16, 6 }
  0x2d   :  { %v533_v49 = vshrl.u32 %v2909_v58, 16  ;;  %v2297_v50 = vcombine.low %v242_v36, %v245_v37  ;;  %v380_v51 = vsel %vm102_vm0, %v366_v23, 0  ;;  %v536_v53 = vshll.u32 %v2909_v58, 16 }
  0x2e   :  { %v332_v54 = vsel %vm2959_vm15, %v328_v39, %v331_v30  ;;  %v342_v55 = vsel %vm2959_vm15, %v333_v40, %v341_v41  ;;  %v360_v57 = vrot.slane %v358_v42, 5  ;;  %v2985_v59 = vsel %vm102_vm0, %v458_v38, 0 }
  0x2f   :  { %v351_v61 = vrot.slane %v350_v44, 4  ;;  %v356_v62 = vrot.slane %v2963_v45, 4  ;;  %v363_v63 = vrot.slane %v361_v46, 6  ;;  %v2305_v58 = vrot.slane %v2969_v47, 10 }
  0x30   :  { %v455_v1 = vrot.slane %v453_v48, 4  ;;  %v456_v3 = vrot.slane %v2937_v27, 6  ;;  %v2998_v4 = vrot.slane %v533_v49, 6  ;;  %v541_v5 = vrot.slane %v2838_v8, 6 }
  0x31   :  { %2463 = vmatmul.mubr.msk.bf16.vlgmr.msra.gmra.mrb[0].mxu0 %vm95_vm4, %v2291_v18  ;;  %v2300_v6 = vcombine.low %v332_v54, %v342_v55  ;;  %v538_v10 = vrot.slane %v536_v53, 7  ;;  %v542_v11 = vrot.slane %v2835_v7, 7  ;;  %v547_v13 = vshrl.u32 %v2977_v52, 16 }
  0x32   :  { %2467 = vmatpush3.bf16.msra.mxu0 %v260_v12  ;;  %2468 = vmatprep.mubr.msk.bf16.mxu0 %vm95_vm4, %v2296_v19  ;;  %v740_v12 = vld [vmem:[%s3330_s0 + $0x14] sm:$0xf]  ;;  %v745_v15 = vshrl.u32 %v2995_v0, 16  ;;  %v749_v18 = vrot.slane %v2838_v8, 7  ;;  %v754_v19 = vshrl.u32 %v739_v60, 16  ;;  %v364_v22 = vor.u32 %v363_v63, %v360_v57 }
  0x33   :  { %2663 = vmatprep.subr.msk.bf16.mxu0 %vm102_vm0, %v366_v23  ;;  %v454_v23 = vsel %vm2926_vm10, %v2305_v58, %v453_v48  ;;  %v757_v27 = vshll.u32 %v739_v60, 16  ;;  %v457_v8 = vsel %vm2926_vm10, %v455_v1, %v456_v3  ;;  %v762_v31 = vshrl.u32 %v3010_v17, 16  ;;  %v578_v57 = vld [vmem:[#allocation3 + $0x14] sm:$0xf]  ;;  %v528_v1 = vld [vmem:[%s3330_s0 + $0x14] sm:$0x7] }
  0x34   :  { %v2320_v26 = vrot.slane %v745_v15, 11  ;;  %v750_v28 = vor.u32 %v749_v18, %v2835_v7  ;;  %v752_v29 = vrot.slane %v749_v18, 4  ;;  %v756_v30 = vrot.slane %v754_v19, 7 }
  0x35   :  { %v766_v14 = vrot.slane %v2871_v25, 7  ;;  %v771_v32 = vshrl.u32 %v740_v12, 16  ;;  %v774_v33 = vshll.u32 %v740_v12, 16  ;;  %v550_v34 = vshll.u32 %v2977_v52, 16 }
  0x36   :  { %v751_v36 = vsel %vm3018_vm1, %v2320_v26, %v750_v28  ;;  %v759_v37 = vor.u32 %v757_v27, %v756_v30  ;;  %v876_v9 = vsel %vm102_vm0, %v2900_v56, 0  ;;  %v2321_v7 = vrot.slane %v762_v31, 11 }
  0x37   :  { %v767_v39 = vor.u32 %v766_v14, %v2862_v21  ;;  %v769_v40 = vrot.slane %v766_v14, 4  ;;  %2503 = vmatpush3.bf16.msra.mxu1 %v876_v9  ;;  %v355_v41 = vsel %vm2959_vm15, %v351_v61, %v2963_v45  ;;  %v365_v42 = vsel %vm2959_vm15, %v356_v62, %v364_v22 }
  0x38   :  { %v2307_v44 = vcombine.low %v454_v23, %v457_v8  ;;  %v760_v46 = vsel %vm3018_vm1, %v752_v29, %v759_v37  ;;  %2508 = vmatprep.subr.bf16.mxu1 %v2679_v20  ;;  %v543_v53 = vor.u32 %v542_v11, %v541_v5  ;;  %v549_v54 = vrot.slane %v547_v13, 6 }
  0x39   :  { %v3042_v48 = vcombine.low %v751_v36, %v760_v46  ;;  %v768_v56 = vsel %vm3018_vm1, %v2321_v7, %v767_v39  ;;  %v552_v55 = vrot.slane %v550_v34, 7  ;;  %vm529_vm2 = vsmask.f32 1280 }
  0x3a   :  { %2505 = vmatmul.mubr.msk.bf16.vlgmr.msra.gmra.mrb[0].mxu1 %vm95_vm4, %v2307_v44  ;;  %vm530_vm3 = vsmask.f32 5392  ;;  %v556_v60 = vshrl.u32 %v2969_v47, 16  ;;  %v559_v61 = vshll.u32 %v2969_v47, 16  ;;  %v545_v63 = vrot.slane %v543_v53, 4 }
  0x3b   :  { %2509 = vmatpush3.bf16.msra.mxu1 %v2679_v20  ;;  %v553_v58 = vor.u32 %v552_v55, %v549_v54  ;;  %vm3062_vm5 = vmor %vm529_vm2, %vm530_vm3  ;;  %v570_v47 = vshrl.u32 %v528_v1, 16  ;;  %v592_v20 = vsel %vm102_vm0, %v578_v57, 0  ;;  %vm653_vm6 = vcmask 1040384  }
  0x3c   :  { %v561_v5 = vrot.slane %v559_v61, 7  ;;  %vm654_vm7 = vcmask 1044484   ;;  %v2314_v26 = vrot.slane %v2995_v0, 11  ;;  %v661_v8 = vrot.slane %v2977_v52, 7 }
  0x3d   :  { %2469 = vmatmul.mubr.msk.bf16.vlgmr.msra.gmra.mrb[0].mxu0 %vm95_vm4, %v2297_v50  ;;  %v2301_v50 = vcombine.low %v355_v41, %v365_v42  ;;  %v554_v11 = vsel %vm3062_vm5, %v545_v63, %v553_v58  ;;  %v572_v18 = vrot.slane %v570_v47, 6  ;;  %vm3079_vm8 = vmor %vm653_vm6, %vm654_vm7  ;;  %v665_v52 = vrot.slane %v2852_v16, 7  ;;  %v2682_v63 = vld [vmem:[#allocation3 + $0x50] sm:$0xff]   ;;  %v3112_v58 = vld [vmem:[#allocation3 + $0x38] sm:$0xff]  }
  0x3e   :  { %2473 = vmatpush3.bf16.msra.mxu0 %v380_v51  ;;  %2474 = vmatprep.mubr.msk.bf16.mxu0 %vm95_vm4, %v2300_v6  ;;  %v539_v51 = vor.u32 %v538_v10, %v2998_v4  ;;  %v558_v4 = vrot.slane %v556_v60, 6  ;;  %v573_v6 = vshll.u32 %v528_v1, 16  ;;  %v2315_v34 = vrot.slane %v3010_v17, 11  ;;  %v2680_v17 = vld [vmem:[#allocation3 + $0x28] sm:$0xff]  }
  0x3f   :  { %2664 = vmatprep.subr.msk.bf16.mxu0 %vm102_vm0, %v458_v38  ;;  %v773_v38 = vrot.slane %v771_v32, 7  ;;  %v667_v36 = vrot.slane %v665_v52, 4  ;;  %v668_v37 = vrot.slane %v528_v1, 7  ;;  %2510 = vmatprep.subr.bf16.mxu1 %v2680_v17  ;;  %vm939_vm11 = vcmask 261120   ;;  %v2333_v1 = vld [vmem:[%s3332_s2 + $0x1] ss:$0 sm:$0xff] }
  0x40   :  { %v540_v62 = vrot.slane %v539_v51, 4  ;;  %v562_v15 = vor.u32 %v561_v5, %v558_v4  ;;  %v575_v19 = vrot.slane %v573_v6, 7  ;;  %v666_v9 = vsel %vm3079_vm8, %v2315_v34, %v665_v52  ;;  %2511 = vmatpush3.bf16.msra.mxu1 %v2680_v17 }
  0x41   :  { %v776_v49 = vor.u32 %v774_v33, %v773_v38  ;;  %v778_v33 = vld [vmem:[#allocation3 + $0x1c] sm:$0xf]  ;;  %v669_v16 = vsel %vm3079_vm8, %v667_v36, %v668_v37  ;;  %vm1083_vm12 = vcmask 254977   ;;  %vm1086_vm13 = vcmask 260102  }
  0x42   :  { %v544_v10 = vsel %vm3062_vm5, %v540_v62, %v543_v53  ;;  %v563_v22 = vrot.slane %v562_v15, 4  ;;  %v576_v24 = vor.u32 %v575_v19, %v572_v18  ;;  %v2317_v7 = vcombine.low %v666_v9, %v669_v16  ;;  %v2681_v62 = vld [vmem:[#allocation3 + $0x48] sm:$0xff]  }
  0x43   :  { %v777_v45 = vsel %vm3018_vm1, %v769_v40, %v776_v49  ;;  %v2310_v13 = vcombine.low %v544_v10, %v554_v11  ;;  %v792_v39 = vsel %vm102_vm0, %v778_v33, 0  ;;  %v2326_v40 = vld [vmem:[%s3332_s2] ss:$0 sm:$0xff]  ;;  %2516 = vmatprep.subr.bf16.mxu1 %v2681_v62  ;;  %vm2779_vm3 = vmmov 0  }
  0x44   :  { %v3049_v43 = vcombine.low %v768_v56, %v777_v45 }
  0x49   :  { %2475 = vmatmul.mubr.msk.bf16.vlgmr.msra.gmra.mrb[0].mxu0 %vm95_vm4, %v2301_v50 }
  0x4a   :  { %2479 = vmatpush3.bf16.msra.mxu0 %v2985_v59  ;;  %2480 = vmatprep.mubr.msk.bf16.mxu0 %vm95_vm4, %v2946_v35  ;;  %v564_v59 = vrot.slane %v2871_v25, 6  ;;  %v565_v35 = vrot.slane %v2862_v21, 7  ;;  %v658_v25 = vrot.slane %v2823_v2, 7  ;;  %v670_v21 = vld [vmem:[#allocation3 + $0x18] sm:$0xf] }
  0x4b   :  { %2665 = vmatprep.subr.msk.bf16.mxu0 %vm102_vm0, %v578_v57  ;;  %v684_v32 = vsel %vm102_vm0, %v670_v21, 0 }
  0x4c   :  { %v566_v12 = vor.u32 %v565_v35, %v564_v59  ;;  %v660_v27 = vrot.slane %v658_v25, 4  ;;  %v659_v30 = vsel %vm3079_vm8, %v2314_v26, %v658_v25 }
  0x4e   :  { %v568_v23 = vrot.slane %v566_v12, 4  ;;  %v567_v28 = vsel %vm3062_vm5, %v563_v22, %v566_v12  ;;  %v662_v31 = vsel %vm3079_vm8, %v660_v27, %v661_v8 }
  0x4f   :  { %v2316_v14 = vcombine.low %v659_v30, %v662_v31 }
  0x50   :  { %v577_v29 = vsel %vm3062_vm5, %v568_v23, %v576_v24 }
  0x51   :  { %v2311_v0 = vcombine.low %v567_v28, %v577_v29 }
  0x55   :  { %2481 = vmatmul.mubr.msk.bf16.vlgmr.msra.gmra.mrb[0].mxu0 %vm95_vm4, %v2307_v44 }
  0x56   :  { %2485 = vmatpush3.bf16.msra.mxu0 %v592_v20  ;;  %2486 = vmatprep.mubr.msk.bf16.mxu0 %vm95_vm4, %v2310_v13 }
  0x57   :  { %2666 = vmatprep.subr.msk.bf16.mxu0 %vm102_vm0, %v670_v21 }
  0x61   :  { %2487 = vmatmul.mubr.msk.bf16.vlgmr.msra.gmra.mrb[0].mxu0 %vm95_vm4, %v2311_v0 }
  0x62   :  { %2491 = vmatpush3.bf16.msra.mxu0 %v684_v32  ;;  %2492 = vmatprep.mubr.msk.bf16.mxu0 %vm95_vm4, %v2316_v14 }
  0x63   :  { %2667 = vmatprep.subr.msk.bf16.mxu0 %vm102_vm0, %v778_v33 }
  0x6d   :  { %2493 = vmatmul.mubr.msk.bf16.vlgmr.msra.gmra.mrb[0].mxu0 %vm95_vm4, %v2317_v7 }
  0x6e   :  { %2497 = vmatpush3.bf16.msra.mxu0 %v792_v39  ;;  %2498 = vmatprep.mubr.msk.bf16.mxu0 %vm95_vm4, %v3042_v48 }
  0x79   :  { %2499 = vmatmul.mubr.msk.bf16.vlgmr.msra.gmra.mrb[0].mxu0 %vm95_vm4, %v3049_v43 }
 0x14c   :  { %v2500_v38 = vpop.f32.mrb[0].mxu0 }
 0x14d   :  { %v854_v41 = vadd.f32 %v2500_v38, %v2326_v40  ;;  %v828_v42 = vpop.f32.mrb[1].mxu0 }
 0x14e   :  { %v852_v44 = vadd.f32 %v2326_v40, %v828_v42  ;;  %v2501_v46 = vpop.f32.mrb[2].mxu0 }
 0x14f   :  { %v862_v56 = vmul.f32 0.01, %v854_v41  ;;  %v855_v49 = vadd.f32 %v2501_v46, %v2326_v40  ;;  %v831_v50 = vpop.f32.mrb[3].mxu0  ;;  %vm858_vm0 = vcmp.ge.f32.partialorder %v854_v41, 0.0 }
 0x150   :  { %v860_v48 = vmul.f32 0.01, %v852_v44  ;;  %v853_v45 = vadd.f32 %v2326_v40, %v831_v50  ;;  %vm856_vm9 = vcmp.ge.f32.partialorder %v852_v44, 0.0 }
 0x151   :  { %vm859_vm4 = vcmp.ge.f32.partialorder %v855_v49, 0.0  ;;  %v863_v43 = vmul.f32 0.01, %v855_v49  ;;  %v866_v53 = vsel %vm858_vm0, %v854_v41, %v862_v56 }
 0x152   :  { %vm857_vm10 = vcmp.ge.f32.partialorder %v853_v45, 0.0  ;;  %v861_v51 = vmul.f32 0.01, %v853_v45  ;;  %v864_v55 = vsel %vm856_vm9, %v852_v44, %v860_v48 }
 0x153   :  { %v867_v54 = vsel %vm859_vm4, %v855_v49, %v863_v43 }
 0x154   :  { %v869_v57 = vpack.c.bf16 %v867_v54, %v866_v53  ;;  %v865_v60 = vsel %vm857_vm10, %v853_v45, %v861_v51 }
 0x155   :  { %v868_v61 = vpack.c.bf16 %v865_v60, %v864_v55 }
 0x157   :  { %2512 = vmatprep.mubr.msk.bf16.mxu1 %vm939_vm11, %v868_v61 }
 0x158   :  { %2513 = vmatmul.mubr.msk.bf16.vlgmr.msra.gmra.mrb[0].mxu1 %vm939_vm11, %v869_v57 }
 0x159   :  { %2517 = vmatpush3.bf16.msra.mxu1 %v2681_v62 }
 0x15a   :  { %2518 = vmatprep.subr.bf16.mxu1 %v2682_v63 }
 0x15d   :  { %2519 = vmatpush3.bf16.msra.mxu1 %v2682_v63 }
 0x15e   :  { %2524 = vmatprep.subr.bf16.mxu1 %v3112_v58 }
 0x22b   :  { %v2514_v3 = vpop.f32.mrb[0].mxu1 }
 0x22c   :  { %v3118_v59 = vadd.f32 %v2514_v3, %v2333_v1  ;;  %v980_v35 = vpop.f32.mrb[1].mxu1 }
 0x22d   :  { %v3120_v4 = vadd.f32 %v2333_v1, %v980_v35  ;;  %v2515_v5 = vpop.f32.mrb[2].mxu1 }
 0x22e   :  { %v1027_v47 = vmul.f32 %v3118_v59, %v3118_v59  ;;  %v3124_v6 = vadd.f32 %v2515_v5, %v2333_v1  ;;  %v983_v10 = vpop.f32.mrb[3].mxu1  ;;  %v1013_v13 = vsel %vm939_vm11, %v3118_v59, 0.0 }
 0x22f   :  { %v1025_v11 = vmul.f32 %v3120_v4, %v3120_v4  ;;  %v3128_v12 = vadd.f32 %v2333_v1, %v983_v10  ;;  %v1004_v19 = vsel %vm939_vm11, %v3120_v4, 0.0 }
 0x230   :  { %v1014_v15 = vsel %vm939_vm11, %v3124_v6, 0.0  ;;  %v1028_v18 = vmul.f32 %v3124_v6, %v3124_v6  ;;  %v1038_v22 = vsel %vm939_vm11, %v1027_v47, 0.0 }
 0x231   :  { %v1015_v20 = vadd.f32 %v1014_v15, %v1013_v13  ;;  %v1005_v25 = vsel %vm939_vm11, %v3128_v12, 0.0  ;;  %v1026_v21 = vmul.f32 %v3128_v12, %v3128_v12  ;;  %v1029_v26 = vsel %vm939_vm11, %v1025_v11, 0.0 }
 0x232   :  { %v1039_v23 = vsel %vm939_vm11, %v1028_v18, 0.0  ;;  %v1006_v24 = vadd.f32 %v1005_v25, %v1004_v19 }
 0x233   :  { %v1016_v27 = vrot.slane %v1015_v20, 4  ;;  %v1040_v8 = vadd.f32 %v1039_v23, %v1038_v22  ;;  %v1030_v2 = vsel %vm939_vm11, %v1026_v21, 0.0 }
 0x234   :  { %v1007_v28 = vrot.slane %v1006_v24, 4  ;;  %v1031_v29 = vadd.f32 %v1030_v2, %v1029_v26  ;;  %v2684_v2 = vld [vmem:[#allocation3 + $0x40] sm:$0xff]  }
 0x235   :  { %v1017_v30 = vadd.f32 %v1016_v27, %v1015_v20  ;;  %v1041_v31 = vrot.slane %v1040_v8, 4 }
 0x236   :  { %v1008_v0 = vadd.f32 %v1007_v28, %v1006_v24  ;;  %v1032_v14 = vrot.slane %v1031_v29, 4 }
 0x237   :  { %v1018_v52 = vrot.slane %v1017_v30, 2  ;;  %v1042_v32 = vadd.f32 %v1041_v31, %v1040_v8 }
 0x238   :  { %v1009_v33 = vrot.slane %v1008_v0, 2  ;;  %v1033_v34 = vadd.f32 %v1032_v14, %v1031_v29  ;;  %v2685_v29 = vld [vmem:[#allocation3 + $0x58] sm:$0xff]  }
 0x239   :  { %v1019_v36 = vadd.f32 %v1018_v52, %v1017_v30  ;;  %v1043_v37 = vrot.slane %v1042_v32, 2 }
 0x23a   :  { %v1010_v9 = vadd.f32 %v1009_v33, %v1008_v0  ;;  %v1034_v16 = vrot.slane %v1033_v34, 2 }
 0x23b   :  { %v1020_v7 = vrot.slane %v1019_v36, 1  ;;  %v1044_v39 = vadd.f32 %v1043_v37, %v1042_v32  ;;  %v2686_v32 = vld [vmem:[#allocation3 + $0x60] sm:$0xff]   ;;  %v2687_v37 = vld [vmem:[#allocation3 + $0x78] sm:$0xff]  }
 0x23c   :  { %v1011_v17 = vrot.slane %v1010_v9, 1  ;;  %v1035_v40 = vadd.f32 %v1034_v16, %v1033_v34  ;;  %v2688_v16 = vld [vmem:[#allocation3 + $0x80] sm:$0xff]  }
 0x23d   :  { %v1021_v38 = vadd.f32 %v1020_v7, %v1019_v36  ;;  %v1045_v41 = vrot.slane %v1044_v39, 1  ;;  %v2346_v7 = vld [vmem:[%s3332_s2 + $0x3] ss:$0 sm:$0xff] }
 0x23e   :  { %v1012_v42 = vadd.f32 %v1011_v17, %v1010_v9  ;;  %v1036_v44 = vrot.slane %v1035_v40, 1  ;;  %v2778_v9 = vmov 0.0  }
 0x23f   :  { %v1024_v46 = vmul.f32 0.0625, %v1021_v38  ;;  %v1046_v56 = vadd.f32 %v1045_v41, %v1044_v39  ;;  %2564 = vmatprep.subr.bf16.mxu0 %v2778_v9  ;;  %2568 = vmatprep.mubr.msk.bf16.mxu0 %vm2779_vm3, %v2778_v9 }
 0x240   :  { %v1023_v49 = vmul.f32 0.0625, %v1012_v42  ;;  %v1037_v50 = vadd.f32 %v1036_v44, %v1035_v40 }
 0x241   :  { %v1048_v48 = vmul.f32 0.0625, %v1046_v56  ;;  %v1050_v45 = vmul.f32 %v1024_v46, %v1024_v46  ;;  %v1057_v43 = vsub.f32 %v3118_v59, %v1024_v46  ;;  %v1058_v51 = vsub.f32 %v3124_v6, %v1024_v46 }
 0x242   :  { %v1047_v53 = vmul.f32 0.0625, %v1037_v50  ;;  %v1049_v54 = vmul.f32 %v1023_v49, %v1023_v49  ;;  %v1055_v55 = vsub.f32 %v3120_v4, %v1023_v49  ;;  %v1056_v57 = vsub.f32 %v3128_v12, %v1023_v49 }
 0x243   :  { %v1052_v60 = vsub.f32 %v1048_v48, %v1050_v45 }
 0x244   :  { %v1051_v61 = vsub.f32 %v1047_v53, %v1049_v54 }
 0x245   :  { %v1054_v62 = vmax.f32 %v1052_v60, 0.0 }
 0x246   :  { %v1053_v63 = vmax.f32 %v1051_v61, 0.0 }
 0x247   :  { %v1060_v1 = vadd.f32 1e-05, %v1054_v62 }
 0x248   :  { %v1059_v3 = vadd.f32 1e-05, %v1053_v63 }
 0x249   :  { %2707 = vrsqrt.f32 %v1060_v1 }
 0x24a   :  { %2709 = vrsqrt.f32 %v1059_v3 }
 0x253   :  { %v2708_v35 = vpop.eup %2707 }
 0x254   :  { %v2710_v5 = vpop.eup %2709  ;;  %v1065_v47 = vmul.f32 %v2708_v35, %v1057_v43  ;;  %v1066_v59 = vmul.f32 %v2708_v35, %v1058_v51 }
 0x255   :  { %v1063_v6 = vmul.f32 %v2710_v5, %v1055_v55  ;;  %v1064_v10 = vmul.f32 %v2710_v5, %v1056_v57 }
 0x256   :  { %vm1069_vm14 = vcmp.ge.f32.partialorder %v1065_v47, 0.0  ;;  %vm1070_vm15 = vcmp.ge.f32.partialorder %v1066_v59, 0.0  ;;  %v1073_v4 = vmul.f32 0.01, %v1065_v47  ;;  %v1074_v11 = vmul.f32 0.01, %v1066_v59 }
 0x257   :  { %vm1067_vm1 = vcmp.ge.f32.partialorder %v1063_v6, 0.0  ;;  %vm1068_vm2 = vcmp.ge.f32.partialorder %v1064_v10, 0.0  ;;  %v1071_v12 = vmul.f32 0.01, %v1063_v6  ;;  %v1072_v13 = vmul.f32 0.01, %v1064_v10 }
 0x258   :  { %v1077_v15 = vsel %vm1069_vm14, %v1065_v47, %v1073_v4  ;;  %v1078_v18 = vsel %vm1070_vm15, %v1066_v59, %v1074_v11 }
 0x259   :  { %1081 = vst.msk [vmem:[#allocation2 + $0x19] sm:$0xff] %vm939_vm11, %v1077_v15  ;;  %1082 = vst.msk [vmem:[#allocation2 + $0x21] sm:$0xff] %vm939_vm11, %v1078_v18  ;;  %v1075_v19 = vsel %vm1067_vm1, %v1063_v6, %v1071_v12  ;;  %v1076_v20 = vsel %vm1068_vm2, %v1064_v10, %v1072_v13 }
 0x25a   :  { %1085 = vst.msk [vmem:[#allocation2 + $0x17] sm:$0x2] %vm1083_vm12, %v1077_v15  ;;  %1084 = vst.msk [vmem:[#allocation2 - $0x1] sm:$0x2] %vm1083_vm12, %v1075_v19 }
 0x25b   :  { %1088 = vst.msk [vmem:[#allocation2 + $0x23] sm:$0x40] %vm1086_vm13, %v1078_v18  ;;  %1087 = vst.msk [vmem:[#allocation2 + $0xb] sm:$0x40] %vm1086_vm13, %v1076_v20 }
 0x25c   :  { %1079 = vst.msk [vmem:[#allocation2 + $0x1] sm:$0xff] %vm939_vm11, %v1075_v19  ;;  %1080 = vst.msk [vmem:[#allocation2 + $0x9] sm:$0xff] %vm939_vm11, %v1076_v20 }
 0x260   :  { %v1101_v21 = vld [vmem:[#allocation2 + $0x19] sm:$0xff]  ;;  %v1102_v23 = vld [vmem:[#allocation2 + $0x21] sm:$0xff] }
 0x261   :  { %v1108_v8 = vpack.c.bf16 %v1102_v23, %v1101_v21  ;;  %v1091_v30 = vld [vmem:[#allocation2 + $0x18] sm:$0xff]  ;;  %v1092_v31 = vld [vmem:[#allocation2 + $0x20] sm:$0xff] }
 0x262   :  { %v1098_v52 = vpack.c.bf16 %v1092_v31, %v1091_v30  ;;  %v1246_v34 = vld [vmem:[#allocation2 + $0x22] sm:$0xff] }
 0x263   :  { %v1099_v25 = vld [vmem:[#allocation2 + $0x1] sm:$0xff]  ;;  %v1100_v22 = vld [vmem:[#allocation2 + $0x9] sm:$0xff] }
 0x264   :  { %v1089_v24 = vld [vmem:[#allocation2] sm:$0xff]  ;;  %v1107_v26 = vpack.c.bf16 %v1100_v22, %v1099_v25  ;;  %v1090_v27 = vld [vmem:[#allocation2 + $0x8] sm:$0xff] }
 0x265   :  { %v1097_v28 = vpack.c.bf16 %v1090_v27, %v1089_v24  ;;  %v1243_v0 = vld [vmem:[#allocation2 + $0x2] sm:$0xff]  ;;  %v1244_v14 = vld [vmem:[#allocation2 + $0xa] sm:$0xff] }
 0x266   :  { %2520 = vmatprep.mubr.msk.bf16.mxu1 %vm939_vm11, %v1107_v26  ;;  %v1251_v33 = vpack.c.bf16 %v1244_v14, %v1243_v0 }
 0x267   :  { %2521 = vmatmul.mubr.msk.bf16.vlgmr.msra.gmra.mrb[4].mxu1 %vm939_vm11, %v1108_v8 }
 0x268   :  { %2525 = vmatpush3.bf16.msra.mxu1 %v3112_v58  ;;  %2528 = vmatprep.mubr.msk.bf16.mxu1 %vm939_vm11, %v1097_v28  ;;  %v1245_v58 = vld [vmem:[#allocation2 + $0x1a] sm:$0xff] }
 0x269   :  { %2526 = vmatprep.subr.bf16.mxu1 %v2684_v2  ;;  %v1252_v36 = vpack.c.bf16 %v1246_v34, %v1245_v58 }
 0x26c   :  { %2527 = vmatpush3.bf16.msra.mxu1 %v2684_v2 }
 0x26d   :  { %2532 = vmatprep.subr.bf16.mxu1 %v2685_v29 }
 0x273   :  { %2529 = vmatmul.mubr.msk.bf16.vlgmr.msra.gmra.mrb[4].mxu1 %vm939_vm11, %v1098_v52 }
 0x274   :  { %2533 = vmatpush3.bf16.msra.mxu1 %v2685_v29  ;;  %2536 = vmatprep.mubr.msk.bf16.mxu1 %vm939_vm11, %v1251_v33 }
 0x275   :  { %2534 = vmatprep.subr.bf16.mxu1 %v2686_v32 }
 0x278   :  { %2535 = vmatpush3.bf16.msra.mxu1 %v2686_v32 }
 0x279   :  { %2540 = vmatprep.subr.bf16.mxu1 %v2778_v9 }
 0x27f   :  { %2537 = vmatmul.mubr.msk.bf16.vlgmr.msra.gmra.mrb[4].mxu1 %vm939_vm11, %v1252_v36 }
 0x280   :  { %2544 = vmatprep.mubr.msk.bf16.mxu1 %vm2779_vm3, %v2778_v9  ;;  %2541 = vmatpush3.bf16.msra.mxu1 %v2687_v37 }
 0x281   :  { %2542 = vmatprep.subr.bf16.mxu1 %v2778_v9 }
 0x284   :  { %2543 = vmatpush3.bf16.msra.mxu1 %v2688_v16 }
 0x285   :  { %2548 = vmatprep.subr.bf16.mxu1 %v2778_v9 }
 0x352   :  { %v2538_v39 = vpop.f32.mrb[4].mxu1 }
 0x353   :  { %v3176_v17 = vadd.f32 %v2538_v39, %v2346_v7  ;;  %v1305_v40 = vpop.f32.mrb[5].mxu1 }
 0x354   :  { %v3178_v38 = vadd.f32 %v2346_v7, %v1305_v40  ;;  %v2539_v41 = vpop.f32.mrb[6].mxu1 }
 0x355   :  { %v1355_v42 = vmul.f32 %v3176_v17, %v3176_v17  ;;  %v3182_v44 = vadd.f32 %v2539_v41, %v2346_v7  ;;  %v1308_v46 = vpop.f32.mrb[7].mxu1  ;;  %v1342_v50 = vsel %vm939_vm11, %v3176_v17, 0.0 }
 0x356   :  { %v1353_v56 = vmul.f32 %v3178_v38, %v3178_v38  ;;  %v3186_v49 = vadd.f32 %v2346_v7, %v1308_v46  ;;  %v1333_v43 = vsel %vm939_vm11, %v3178_v38, 0.0 }
 0x357   :  { %v1343_v48 = vsel %vm939_vm11, %v3182_v44, 0.0  ;;  %v1356_v45 = vmul.f32 %v3182_v44, %v3182_v44  ;;  %v1366_v55 = vsel %vm939_vm11, %v1355_v42, 0.0 }
 0x358   :  { %v1344_v51 = vadd.f32 %v1343_v48, %v1342_v50  ;;  %v1334_v53 = vsel %vm939_vm11, %v3186_v49, 0.0  ;;  %v1354_v54 = vmul.f32 %v3186_v49, %v3186_v49  ;;  %v1357_v61 = vsel %vm939_vm11, %v1353_v56, 0.0  ;;  %v3208_v48 = vld [vmem:[#allocation2 + $0x19] ss:$2 sm:$0xff] }
 0x359   :  { %v1367_v57 = vsel %vm939_vm11, %v1356_v45, 0.0  ;;  %v1335_v60 = vadd.f32 %v1334_v53, %v1333_v43  ;;  %v3210_v45 = vld [vmem:[#allocation2 + $0x1a] ss:$2 sm:$0xff]  ;;  %v3212_v53 = vld [vmem:[#allocation2 + $0x1] ss:$2 sm:$0xff] }
 0x35a   :  { %v1345_v62 = vrot.slane %v1344_v51, 4  ;;  %v1368_v63 = vadd.f32 %v1367_v57, %v1366_v55  ;;  %v1358_v1 = vsel %vm939_vm11, %v1354_v54, 0.0  ;;  %v3214_v54 = vld [vmem:[#allocation2 + $0x2] ss:$2 sm:$0xff] }
 0x35b   :  { %v1336_v3 = vrot.slane %v1335_v60, 4  ;;  %v1359_v35 = vadd.f32 %v1358_v1, %v1357_v61  ;;  %v2690_v1 = vld [vmem:[#allocation3 + $0x70] sm:$0xff]  }
 0x35c   :  { %v1346_v5 = vadd.f32 %v1345_v62, %v1344_v51  ;;  %v1369_v47 = vrot.slane %v1368_v63, 4  ;;  %v2689_v62 = vld [vmem:[#allocation3 + $0x68] sm:$0xff]  }
 0x35d   :  { %v1337_v59 = vadd.f32 %v1336_v3, %v1335_v60  ;;  %v1360_v6 = vrot.slane %v1359_v35, 4 }
 0x35e   :  { %v1347_v10 = vrot.slane %v1346_v5, 2  ;;  %v1370_v4 = vadd.f32 %v1369_v47, %v1368_v63 }
 0x35f   :  { %v1338_v11 = vrot.slane %v1337_v59, 2  ;;  %v1361_v12 = vadd.f32 %v1360_v6, %v1359_v35 }
 0x360   :  { %v1348_v13 = vadd.f32 %v1347_v10, %v1346_v5  ;;  %v1371_v15 = vrot.slane %v1370_v4, 2  ;;  %v2691_v5 = vld [vmem:[#allocation3 + $0x88] sm:$0xff]  }
 0x361   :  { %v1339_v18 = vadd.f32 %v1338_v11, %v1337_v59  ;;  %v1362_v19 = vrot.slane %v1361_v12, 2  ;;  %v2692_v59 = vld [vmem:[#allocation3 + $0x90] sm:$0xff]   ;;  %v2693_v11 = vld [vmem:[#allocation3 + $0xa8] sm:$0xff]  }
 0x362   :  { %v1349_v20 = vrot.slane %v1348_v13, 1  ;;  %v1372_v25 = vadd.f32 %v1371_v15, %v1370_v4  ;;  %2565 = vmatpush3.bf16.msra.mxu0 %v2693_v11  ;;  %v2696_v15 = vld [vmem:[#allocation3 + $0xa0] sm:$0xff]  }
 0x363   :  { %v1340_v21 = vrot.slane %v1339_v18, 1  ;;  %v1363_v22 = vadd.f32 %v1362_v19, %v1361_v12  ;;  %v2694_v12 = vld [vmem:[#allocation3 + $0x98] sm:$0xff]   ;;  %2566 = vmatprep.subr.bf16.mxu0 %v2778_v9 }
 0x364   :  { %v1350_v23 = vadd.f32 %v1349_v20, %v1348_v13  ;;  %v1373_v24 = vrot.slane %v1372_v25, 1  ;;  %v2695_v13 = vld [vmem:[#allocation3 + $0xb0] sm:$0xff]  }
 0x365   :  { %v1341_v26 = vadd.f32 %v1340_v21, %v1339_v18  ;;  %v1364_v27 = vrot.slane %v1363_v22, 1 }
 0x366   :  { %v1352_v8 = vmul.f32 0.0625, %v1350_v23  ;;  %v1374_v2 = vadd.f32 %v1373_v24, %v1372_v25  ;;  %2567 = vmatpush3.bf16.msra.mxu0 %v2695_v13 }
 0x367   :  { %v1351_v28 = vmul.f32 0.0625, %v1341_v26  ;;  %v1365_v29 = vadd.f32 %v1364_v27, %v1363_v22  ;;  %2580 = vmatprep.subr.bf16.mxu0 %v2778_v9 }
 0x368   :  { %v1376_v30 = vmul.f32 0.0625, %v1374_v2  ;;  %v1378_v31 = vmul.f32 %v1352_v8, %v1352_v8  ;;  %v1385_v0 = vsub.f32 %v3176_v17, %v1352_v8  ;;  %v1386_v14 = vsub.f32 %v3182_v44, %v1352_v8  ;;  %v2356_v2 = vld [vmem:[%s3332_s2 + $0x4] ss:$0 sm:$0xff] }
 0x369   :  { %v1375_v52 = vmul.f32 0.0625, %v1365_v29  ;;  %v1377_v32 = vmul.f32 %v1351_v28, %v1351_v28  ;;  %v1383_v33 = vsub.f32 %v3178_v38, %v1351_v28  ;;  %v1384_v58 = vsub.f32 %v3186_v49, %v1351_v28 }
 0x36a   :  { %v1380_v34 = vsub.f32 %v1376_v30, %v1378_v31 }
 0x36b   :  { %v1379_v36 = vsub.f32 %v1375_v52, %v1377_v32 }
 0x36c   :  { %v1382_v37 = vmax.f32 %v1380_v34, 0.0 }
 0x36d   :  { %v1381_v16 = vmax.f32 %v1379_v36, 0.0 }
 0x36e   :  { %v1388_v7 = vadd.f32 1e-05, %v1382_v37 }
 0x36f   :  { %v1387_v39 = vadd.f32 1e-05, %v1381_v16 }
 0x370   :  { %2711 = vrsqrt.f32 %v1388_v7 }
 0x371   :  { %2713 = vrsqrt.f32 %v1387_v39 }
 0x37a   :  { %v2712_v40 = vpop.eup %2711 }
 0x37b   :  { %v2714_v41 = vpop.eup %2713  ;;  %v1393_v42 = vmul.f32 %v2712_v40, %v1385_v0  ;;  %v1394_v17 = vmul.f32 %v2712_v40, %v1386_v14 }
 0x37c   :  { %v1391_v46 = vmul.f32 %v2714_v41, %v1383_v33  ;;  %v1392_v44 = vmul.f32 %v2714_v41, %v1384_v58 }
 0x37d   :  { %vm1397_vm5 = vcmp.ge.f32.partialorder %v1393_v42, 0.0  ;;  %vm1398_vm6 = vcmp.ge.f32.partialorder %v1394_v17, 0.0  ;;  %v1401_v56 = vmul.f32 0.01, %v1393_v42  ;;  %v1402_v38 = vmul.f32 0.01, %v1394_v17 }
 0x37e   :  { %vm1395_vm7 = vcmp.ge.f32.partialorder %v1391_v46, 0.0  ;;  %vm1396_vm8 = vcmp.ge.f32.partialorder %v1392_v44, 0.0  ;;  %v1399_v49 = vmul.f32 0.01, %v1391_v46  ;;  %v1400_v50 = vmul.f32 0.01, %v1392_v44 }
 0x37f   :  { %v1405_v43 = vsel %vm1397_vm5, %v1393_v42, %v1401_v56  ;;  %v1406_v51 = vsel %vm1398_vm6, %v1394_v17, %v1402_v38 }
 0x380   :  { %1421 = vst.msk [vmem:[#allocation2 + $0x19] sm:$0xff] %vm939_vm11, %v1405_v43  ;;  %1422 = vst.msk [vmem:[#allocation2 + $0x21] sm:$0xff] %vm939_vm11, %v1406_v51  ;;  %v1403_v55 = vsel %vm1395_vm7, %v1391_v46, %v1399_v49  ;;  %v1404_v57 = vsel %vm1396_vm8, %v1392_v44, %v1400_v50 }
 0x381   :  { %1424 = vst.msk [vmem:[#allocation2 + $0x17] sm:$0x2] %vm1083_vm12, %v1405_v43  ;;  %1423 = vst.msk [vmem:[#allocation2 - $0x1] sm:$0x2] %vm1083_vm12, %v1403_v55 }
 0x382   :  { %1426 = vst.msk [vmem:[#allocation2 + $0x23] sm:$0x40] %vm1086_vm13, %v1406_v51  ;;  %1425 = vst.msk [vmem:[#allocation2 + $0xb] sm:$0x40] %vm1086_vm13, %v1404_v57 }
 0x383   :  { %1419 = vst.msk [vmem:[#allocation2 + $0x1] sm:$0xff] %vm939_vm11, %v1403_v55  ;;  %1420 = vst.msk [vmem:[#allocation2 + $0x9] sm:$0xff] %vm939_vm11, %v1404_v57 }
 0x387   :  { %v1436_v60 = vld [vmem:[#allocation2 + $0x19] ss:$2 sm:$0xff]  ;;  %v1555_v10 = vld [vmem:[#allocation2 + $0x1a] ss:$2 sm:$0xff] }
 0x388   :  { %v1429_v35 = vld [vmem:[#allocation2 + $0x18] ss:$2 sm:$0xff] }
 0x38a   :  { %v1435_v61 = vld [vmem:[#allocation2 + $0x1] ss:$2 sm:$0xff]  ;;  %v1427_v3 = vld [vmem:[#allocation2] ss:$2 sm:$0xff] }
 0x38b   :  { %v1441_v63 = vpack.c.bf16 %v1436_v60, %v1435_v61  ;;  %v1434_v47 = vpack.c.bf16 %v1429_v35, %v1427_v3  ;;  %v1554_v6 = vld [vmem:[#allocation2 + $0x2] ss:$2 sm:$0xff] }
 0x38c   :  { %v1560_v4 = vpack.c.bf16 %v1555_v10, %v1554_v6 }
 0x38d   :  { %2545 = vmatmul.mubr.msk.bf16.vlgmr.msra.gmra.mrb[8].mxu1 %vm939_vm11, %v1441_v63 }
 0x38e   :  { %2549 = vmatpush3.bf16.msra.mxu1 %v2689_v62  ;;  %2552 = vmatprep.mubr.msk.bf16.mxu1 %vm2779_vm3, %v2778_v9 }
 0x38f   :  { %2550 = vmatprep.subr.bf16.mxu1 %v2778_v9 }
 0x392   :  { %2551 = vmatpush3.bf16.msra.mxu1 %v2690_v1 }
 0x393   :  { %2556 = vmatprep.subr.bf16.mxu1 %v2778_v9 }
 0x395   :  { %2553 = vmatmul.mubr.msk.bf16.vlgmr.msra.gmra.mrb[12].mxu1 %vm939_vm11, %v1434_v47 }
 0x396   :  { %2557 = vmatpush3.bf16.msra.mxu1 %v2691_v5  ;;  %2560 = vmatprep.mubr.msk.bf16.mxu1 %vm2779_vm3, %v2778_v9 }
 0x397   :  { %2558 = vmatprep.subr.bf16.mxu1 %v2778_v9 }
 0x39a   :  { %2559 = vmatpush3.bf16.msra.mxu1 %v2692_v59 }
 0x39b   :  { %2572 = vmatprep.subr.bf16.mxu1 %v2778_v9 }
 0x39d   :  { %2561 = vmatmul.mubr.msk.bf16.vlgmr.msra.gmra.mrb[16].mxu1 %vm939_vm11, %v1560_v4 }
 0x39e   :  { %2576 = vmatprep.mubr.msk.bf16.mxu1 %vm2779_vm3, %v2778_v9  ;;  %2573 = vmatpush3.bf16.msra.mxu1 %v2694_v12 }
 0x39f   :  { %2574 = vmatprep.subr.bf16.mxu1 %v2778_v9 }
 0x3a2   :  { %2575 = vmatpush3.bf16.msra.mxu1 %v2696_v15 }
 0x3a3   :  { %2588 = vmatprep.subr.bf16.mxu1 %v2778_v9 }
 0x460   :  { %v1491_v18 = vpop.f32.mrb[8].mxu1 }
 0x461   :  { %v2546_v19 = vpop.f32.mrb[9].mxu1 }
 0x462   :  { %v1494_v20 = vpop.f32.mrb[10].mxu1 }
 0x463   :  { %v2547_v25 = vpop.f32.mrb[11].mxu1 }
 0x468   :  { %v1547_v21 = vpop.f32.mrb[12].mxu1 }
 0x469   :  { %v1548_v22 = vadd.f32 %v1547_v21, %v1491_v18  ;;  %v2554_v23 = vpop.f32.mrb[13].mxu1  ;;  %v1415_v21 = vadd.f32 %v3214_v54, %v3212_v53 }
 0x46a   :  { %v1550_v24 = vpop.f32.mrb[14].mxu1 }
 0x46b   :  { %v1551_v26 = vadd.f32 %v1550_v24, %v1494_v20  ;;  %v2555_v27 = vpop.f32.mrb[15].mxu1 }
 0x46c   :  { %v1416_v27 = vadd.f32 %v3210_v45, %v3208_v48  ;;  %v2697_v45 = vld [vmem:[#allocation3 + $0xb8] sm:$0xff]  }
 0x470   :  { %v1610_v8 = vpop.f32.mrb[16].mxu1 }
 0x471   :  { %v1617_v28 = vadd.f32 %v1610_v8, %v1548_v22  ;;  %v2562_v29 = vpop.f32.mrb[17].mxu1  ;;  %v1417_v8 = vmul.f32 0.5, %v1415_v21 }
 0x472   :  { %v1613_v30 = vpop.f32.mrb[18].mxu1 }
 0x473   :  { %v1624_v31 = vadd.f32 %v2356_v2, %v1617_v28  ;;  %v1618_v0 = vadd.f32 %v1613_v30, %v1551_v26  ;;  %v2563_v14 = vpop.f32.mrb[19].mxu1 }
 0x475   :  { %v1626_v52 = vsel %vm939_vm11, %v1624_v31, 0.0  ;;  %v1643_v32 = vmul.f32 %v1624_v31, %v1624_v31  ;;  %v1625_v33 = vadd.f32 %v2356_v2, %v1618_v0 }
 0x476   :  { %v1627_v58 = vrot.slane %v1626_v52, 4 }
 0x477   :  { %v1645_v34 = vsel %vm939_vm11, %v1643_v32, 0.0  ;;  %v1633_v36 = vsel %vm939_vm11, %v1625_v33, 0.0  ;;  %v1644_v37 = vmul.f32 %v1625_v33, %v1625_v33 }
 0x478   :  { %v1628_v16 = vadd.f32 %v1627_v58, %v1626_v52  ;;  %v1646_v7 = vrot.slane %v1645_v34, 4  ;;  %v1634_v39 = vrot.slane %v1633_v36, 4  ;;  %v2698_v58 = vld [vmem:[#allocation3 + $0xc0] sm:$0xff]  }
 0x479   :  { %v1652_v40 = vsel %vm939_vm11, %v1644_v37, 0.0 }
 0x47a   :  { %v1629_v41 = vrot.slane %v1628_v16, 2  ;;  %v1647_v42 = vadd.f32 %v1646_v7, %v1645_v34  ;;  %v1635_v17 = vadd.f32 %v1634_v39, %v1633_v36  ;;  %v1653_v46 = vrot.slane %v1652_v40, 4  ;;  %v2700_v7 = vld [vmem:[#allocation3 + $0xc8] sm:$0xff]   ;;  %v2701_v39 = vld [vmem:[#allocation3 + $0xe0] sm:$0xff]  }
 0x47c   :  { %v1630_v44 = vadd.f32 %v1629_v41, %v1628_v16  ;;  %v1648_v56 = vrot.slane %v1647_v42, 2  ;;  %v1636_v38 = vrot.slane %v1635_v17, 2  ;;  %v1654_v49 = vadd.f32 %v1653_v46, %v1652_v40  ;;  %v2699_v16 = vld [vmem:[#allocation3 + $0xd8] sm:$0xff]   ;;  %v2702_v40 = vld [vmem:[#allocation3 + $0xd0] sm:$0xff]  }
 0x47e   :  { %v1631_v50 = vrot.slane %v1630_v44, 1  ;;  %v1649_v43 = vadd.f32 %v1648_v56, %v1647_v42  ;;  %v1637_v51 = vadd.f32 %v1636_v38, %v1635_v17  ;;  %v1655_v55 = vrot.slane %v1654_v49, 2 }
 0x480   :  { %v1632_v57 = vadd.f32 %v1631_v50, %v1630_v44  ;;  %v1650_v60 = vrot.slane %v1649_v43, 1  ;;  %v1638_v61 = vrot.slane %v1637_v51, 1  ;;  %v1656_v62 = vadd.f32 %v1655_v55, %v1654_v49  ;;  %v2366_v55 = vld [vmem:[%s3332_s2 + $0x5] ss:$0 sm:$0xff] }
 0x482   :  { %v1641_v63 = vmul.f32 0.125, %v1632_v57  ;;  %v1651_v1 = vadd.f32 %v1650_v60, %v1649_v43  ;;  %v1639_v3 = vadd.f32 %v1638_v61, %v1637_v51  ;;  %v1657_v35 = vrot.slane %v1656_v62, 1 }
 0x484   :  { %v1659_v5 = vmul.f32 0.125, %v1651_v1  ;;  %v1661_v47 = vmul.f32 %v1641_v63, %v1641_v63  ;;  %v1642_v59 = vmul.f32 0.125, %v1639_v3  ;;  %v1658_v6 = vadd.f32 %v1657_v35, %v1656_v62 }
 0x485   :  { %v1667_v20 = vsub.f32 %v1624_v31, %v1641_v63  ;;  %v1418_v31 = vmul.f32 0.5, %v1416_v27 }
 0x486   :  { %v1663_v10 = vsub.f32 %v1659_v5, %v1661_v47  ;;  %v1662_v4 = vmul.f32 %v1642_v59, %v1642_v59  ;;  %v1660_v11 = vmul.f32 0.125, %v1658_v6  ;;  %v1668_v23 = vsub.f32 %v1625_v33, %v1642_v59 }
 0x488   :  { %v1665_v12 = vmax.f32 %v1663_v10, 0.0  ;;  %v1664_v13 = vsub.f32 %v1660_v11, %v1662_v4 }
 0x48a   :  { %v1669_v15 = vadd.f32 1e-05, %v1665_v12  ;;  %v1666_v18 = vmax.f32 %v1664_v13, 0.0 }
 0x48c   :  { %2715 = vrsqrt.f32 %v1669_v15  ;;  %v1670_v19 = vadd.f32 1e-05, %v1666_v18 }
 0x48e   :  { %2717 = vrsqrt.f32 %v1670_v19 }
 0x496   :  { %v2716_v25 = vpop.eup %2715 }
 0x497   :  { %v1673_v22 = vmul.f32 %v2716_v25, %v1667_v20 }
 0x498   :  { %v2718_v24 = vpop.eup %2717 }
 0x499   :  { %vm1675_vm0 = vcmp.ge.f32.partialorder %v1673_v22, 0.0  ;;  %v1677_v26 = vmul.f32 0.01, %v1673_v22  ;;  %v1674_v2 = vmul.f32 %v2718_v24, %v1668_v23 }
 0x49b   :  { %v1679_v28 = vsel %vm1675_vm0, %v1673_v22, %v1677_v26  ;;  %vm1676_vm9 = vcmp.ge.f32.partialorder %v1674_v2, 0.0  ;;  %v1678_v30 = vmul.f32 0.01, %v1674_v2 }
 0x49c   :  { %v3252_v29 = vadd.f32 %v1679_v28, %v1417_v8 }
 0x49d   :  { %v1680_v53 = vsel %vm1676_vm9, %v1674_v2, %v1678_v30 }
 0x49e   :  { %1685 = vst.msk [vmem:[#allocation2 - $0x1] sm:$0x2] %vm1083_vm12, %v3252_v29  ;;  %v3260_v54 = vadd.f32 %v1680_v53, %v1418_v31 }
 0x49f   :  { %1687 = vst.msk [vmem:[#allocation2 + $0x3] sm:$0x40] %vm1086_vm13, %v3252_v29 }
 0x4a0   :  { %1683 = vst.msk [vmem:[#allocation2 + $0x1] sm:$0xff] %vm939_vm11, %v3252_v29  ;;  %1684 = vst.msk [vmem:[#allocation2 + $0x19] sm:$0xff] %vm939_vm11, %v3260_v54 }
 0x4a1   :  { %1686 = vst.msk [vmem:[#allocation2 + $0x17] sm:$0x2] %vm1083_vm12, %v3260_v54 }
 0x4a2   :  { %1688 = vst.msk [vmem:[#allocation2 + $0x1b] sm:$0x40] %vm1086_vm13, %v3260_v54 }
 0x4a7   :  { %v1696_v48 = vld [vmem:[#allocation2 + $0x1] sm:$0xff]  ;;  %v1697_v0 = vld [vmem:[#allocation2 + $0x19] sm:$0xff] }
 0x4a8   :  { %v1689_v14 = vld [vmem:[#allocation2] sm:$0xff]  ;;  %v1690_v52 = vld [vmem:[#allocation2 + $0x18] sm:$0xff]  ;;  %v1702_v32 = vpack.c.bf16 %v1697_v0, %v1696_v48 }
 0x4a9   :  { %v1695_v33 = vpack.c.bf16 %v1690_v52, %v1689_v14  ;;  %v1816_v34 = vld [vmem:[#allocation2 + $0x1a] sm:$0xff]  ;;  %v1815_v36 = vld [vmem:[#allocation2 + $0x2] sm:$0xff] }
 0x4aa   :  { %2569 = vmatmul.mubr.msk.bf16.vlgmr.msra.gmra.mrb[4].mxu0 %vm939_vm11, %v1702_v32  ;;  %v1821_v37 = vpack.c.bf16 %v1816_v34, %v1815_v36 }
 0x4ab   :  { %2577 = vmatmul.mubr.msk.bf16.vlgmr.msra.gmra.mrb[20].mxu1 %vm939_vm11, %v1695_v33  ;;  %2581 = vmatpush3.bf16.msra.mxu0 %v2697_v45 }
 0x4ac   :  { %2584 = vmatprep.mubr.msk.bf16.mxu0 %vm2779_vm3, %v2778_v9  ;;  %2582 = vmatprep.subr.bf16.mxu0 %v2778_v9 }
 0x4ad   :  { %2592 = vmatprep.mubr.msk.bf16.mxu1 %vm2779_vm3, %v2778_v9  ;;  %2589 = vmatpush3.bf16.msra.mxu1 %v2699_v16 }
 0x4ae   :  { %2590 = vmatprep.subr.bf16.mxu1 %v2778_v9 }
 0x4af   :  { %2583 = vmatpush3.bf16.msra.mxu0 %v2698_v58 }
 0x4b0   :  { %2596 = vmatprep.subr.bf16.mxu0 %v2778_v9 }
 0x4b1   :  { %2591 = vmatpush3.bf16.msra.mxu1 %v2701_v39 }
 0x4b2   :  { %2585 = vmatmul.mubr.msk.bf16.vlgmr.msra.gmra.mrb[8].mxu0 %vm939_vm11, %v1821_v37  ;;  %2604 = vmatprep.subr.bf16.mxu1 %v2778_v9 }
 0x4b3   :  { %2600 = vmatprep.mubr.msk.bf16.mxu0 %vm2779_vm3, %v2778_v9  ;;  %2597 = vmatpush3.bf16.msra.mxu0 %v2700_v7 }
 0x4b4   :  { %2598 = vmatprep.subr.bf16.mxu0 %v2778_v9 }
 0x4b7   :  { %2599 = vmatpush3.bf16.msra.mxu0 %v2702_v40 }
 0x4b8   :  { %2612 = vmatprep.subr.bf16.mxu0 %v2778_v9 }
 0x57d   :  { %v1752_v41 = vpop.f32.mrb[4].mxu0 }
 0x57e   :  { %v1808_v42 = vpop.f32.mrb[20].mxu1  ;;  %v2570_v46 = vpop.f32.mrb[5].mxu0 }
 0x57f   :  { %v1809_v17 = vadd.f32 %v1808_v42, %v1752_v41  ;;  %v2578_v44 = vpop.f32.mrb[21].mxu1  ;;  %v1755_v56 = vpop.f32.mrb[6].mxu0 }
 0x580   :  { %v1811_v38 = vpop.f32.mrb[22].mxu1  ;;  %v2571_v50 = vpop.f32.mrb[7].mxu0 }
 0x581   :  { %v1812_v49 = vadd.f32 %v1811_v38, %v1755_v56  ;;  %v2579_v43 = vpop.f32.mrb[23].mxu1 }
 0x585   :  { %v1871_v51 = vpop.f32.mrb[8].mxu0 }
 0x586   :  { %v1878_v57 = vadd.f32 %v1871_v51, %v1809_v17  ;;  %v2586_v60 = vpop.f32.mrb[9].mxu0 }
 0x587   :  { %v1874_v61 = vpop.f32.mrb[10].mxu0 }
 0x588   :  { %v1885_v62 = vadd.f32 %v2366_v55, %v1878_v57  ;;  %v1879_v63 = vadd.f32 %v1874_v61, %v1812_v49  ;;  %v2587_v1 = vpop.f32.mrb[11].mxu0 }
 0x589   :  { %v2704_v1 = vld [vmem:[#allocation3 + $0xf0] sm:$0xff]  }
 0x58a   :  { %v1887_v3 = vsel %vm939_vm11, %v1885_v62, 0.0  ;;  %v1903_v35 = vmul.f32 %v1885_v62, %v1885_v62  ;;  %v1886_v5 = vadd.f32 %v2366_v55, %v1879_v63  ;;  %v2703_v55 = vld [vmem:[#allocation3 + $0xe8] sm:$0xff]  }
 0x58b   :  { %v1888_v47 = vrot.slane %v1887_v3, 4 }
 0x58c   :  { %v1905_v59 = vsel %vm939_vm11, %v1903_v35, 0.0  ;;  %v1894_v6 = vsel %vm939_vm11, %v1886_v5, 0.0  ;;  %v1904_v10 = vmul.f32 %v1886_v5, %v1886_v5 }
 0x58d   :  { %v1889_v4 = vadd.f32 %v1888_v47, %v1887_v3  ;;  %v1906_v11 = vrot.slane %v1905_v59, 4  ;;  %v1895_v12 = vrot.slane %v1894_v6, 4  ;;  %v2705_v47 = vld [vmem:[#allocation3 + $0xf8] sm:$0xff]  }
 0x58e   :  { %v1912_v13 = vsel %vm939_vm11, %v1904_v10, 0.0 }
 0x58f   :  { %v1890_v15 = vrot.slane %v1889_v4, 2  ;;  %v1907_v18 = vadd.f32 %v1906_v11, %v1905_v59  ;;  %v1896_v19 = vadd.f32 %v1895_v12, %v1894_v6  ;;  %v1913_v20 = vrot.slane %v1912_v13, 4  ;;  %v2706_v59 = vld [vmem:[#allocation3 + $0x100] sm:$0xff]  }
 0x591   :  { %v1891_v25 = vadd.f32 %v1890_v15, %v1889_v4  ;;  %v1908_v21 = vrot.slane %v1907_v18, 2  ;;  %v1897_v22 = vrot.slane %v1896_v19, 2  ;;  %v1914_v23 = vadd.f32 %v1913_v20, %v1912_v13 }
 0x593   :  { %v1892_v24 = vrot.slane %v1891_v25, 1  ;;  %v1909_v26 = vadd.f32 %v1908_v21, %v1907_v18  ;;  %v1898_v27 = vadd.f32 %v1897_v22, %v1896_v19  ;;  %v1915_v8 = vrot.slane %v1914_v23, 2  ;;  %v2376_v21 = vld [vmem:[%s3332_s2 + $0x6] ss:$0 sm:$0xff] }
 0x595   :  { %v1893_v2 = vadd.f32 %v1892_v24, %v1891_v25  ;;  %v1910_v28 = vrot.slane %v1909_v26, 1  ;;  %v1899_v30 = vrot.slane %v1898_v27, 1  ;;  %v1916_v31 = vadd.f32 %v1915_v8, %v1914_v23 }
 0x597   :  { %v1901_v53 = vmul.f32 0.125, %v1893_v2  ;;  %v1911_v48 = vadd.f32 %v1910_v28, %v1909_v26  ;;  %v1900_v45 = vadd.f32 %v1899_v30, %v1898_v27  ;;  %v1917_v0 = vrot.slane %v1916_v31, 1 }
 0x599   :  { %v1919_v14 = vmul.f32 0.125, %v1911_v48  ;;  %v1921_v52 = vmul.f32 %v1901_v53, %v1901_v53  ;;  %v1902_v32 = vmul.f32 0.125, %v1900_v45  ;;  %v1918_v33 = vadd.f32 %v1917_v0, %v1916_v31 }
 0x59a   :  { %v1927_v41 = vsub.f32 %v1885_v62, %v1901_v53 }
 0x59b   :  { %v1923_v58 = vsub.f32 %v1919_v14, %v1921_v52  ;;  %v1922_v34 = vmul.f32 %v1902_v32, %v1902_v32  ;;  %v1920_v36 = vmul.f32 0.125, %v1918_v33  ;;  %v1928_v46 = vsub.f32 %v1886_v5, %v1902_v32 }
 0x59d   :  { %v1925_v37 = vmax.f32 %v1923_v58, 0.0  ;;  %v1924_v16 = vsub.f32 %v1920_v36, %v1922_v34 }
 0x59f   :  { %v1929_v7 = vadd.f32 1e-05, %v1925_v37  ;;  %v1926_v39 = vmax.f32 %v1924_v16, 0.0 }
 0x5a1   :  { %2719 = vrsqrt.f32 %v1929_v7  ;;  %v1930_v40 = vadd.f32 1e-05, %v1926_v39 }
 0x5a3   :  { %2721 = vrsqrt.f32 %v1930_v40 }
 0x5ab   :  { %v2720_v42 = vpop.eup %2719 }
 0x5ac   :  { %v1933_v17 = vmul.f32 %v2720_v42, %v1927_v41 }
 0x5ad   :  { %v2722_v44 = vpop.eup %2721 }
 0x5ae   :  { %vm1935_vm4 = vcmp.ge.f32.partialorder %v1933_v17, 0.0  ;;  %v1937_v56 = vmul.f32 0.01, %v1933_v17  ;;  %v1934_v38 = vmul.f32 %v2722_v44, %v1928_v46 }
 0x5b0   :  { %v1939_v49 = vsel %vm1935_vm4, %v1933_v17, %v1937_v56  ;;  %vm1936_vm10 = vcmp.ge.f32.partialorder %v1934_v38, 0.0  ;;  %v1938_v50 = vmul.f32 0.01, %v1934_v38 }
 0x5b1   :  { %1943 = vst.msk [vmem:[#allocation2 - $0x1] sm:$0x2] %vm1083_vm12, %v1939_v49 }
 0x5b2   :  { %1945 = vst.msk [vmem:[#allocation2 + $0x3] sm:$0x40] %vm1086_vm13, %v1939_v49  ;;  %v1940_v43 = vsel %vm1936_vm10, %v1934_v38, %v1938_v50 }
 0x5b3   :  { %1941 = vst.msk [vmem:[#allocation2 + $0x1] sm:$0xff] %vm939_vm11, %v1939_v49  ;;  %1942 = vst.msk [vmem:[#allocation2 + $0x19] sm:$0xff] %vm939_vm11, %v1940_v43 }
 0x5b4   :  { %1944 = vst.msk [vmem:[#allocation2 + $0x17] sm:$0x2] %vm1083_vm12, %v1940_v43 }
 0x5b5   :  { %1946 = vst.msk [vmem:[#allocation2 + $0x1b] sm:$0x40] %vm1086_vm13, %v1940_v43 }
 0x5ba   :  { %v1954_v51 = vld [vmem:[#allocation2 + $0x1] sm:$0xff]  ;;  %v1955_v57 = vld [vmem:[#allocation2 + $0x19] sm:$0xff] }
 0x5bb   :  { %v1947_v60 = vld [vmem:[#allocation2] sm:$0xff]  ;;  %v1948_v61 = vld [vmem:[#allocation2 + $0x18] sm:$0xff]  ;;  %v1960_v62 = vpack.c.bf16 %v1955_v57, %v1954_v51 }
 0x5bc   :  { %v1953_v63 = vpack.c.bf16 %v1948_v61, %v1947_v60  ;;  %v2074_v3 = vld [vmem:[#allocation2 + $0x1a] sm:$0xff]  ;;  %v2073_v35 = vld [vmem:[#allocation2 + $0x2] sm:$0xff] }
 0x5bd   :  { %2593 = vmatmul.mubr.msk.bf16.vlgmr.msra.gmra.mrb[24].mxu1 %vm939_vm11, %v1960_v62  ;;  %v2079_v5 = vpack.c.bf16 %v2074_v3, %v2073_v35 }
 0x5be   :  { %2601 = vmatmul.mubr.msk.bf16.vlgmr.msra.gmra.mrb[12].mxu0 %vm939_vm11, %v1953_v63  ;;  %2605 = vmatpush3.bf16.msra.mxu1 %v2703_v55 }
 0x5bf   :  { %2608 = vmatprep.mubr.msk.bf16.mxu1 %vm2779_vm3, %v2778_v9  ;;  %2606 = vmatprep.subr.bf16.mxu1 %v2778_v9 }
 0x5c0   :  { %2616 = vmatprep.mubr.msk.bf16.mxu0 %vm2779_vm3, %v2778_v9  ;;  %2613 = vmatpush3.bf16.msra.mxu0 %v2705_v47 }
 0x5c1   :  { %2614 = vmatprep.subr.bf16.mxu0 %v2778_v9 }
 0x5c2   :  { %2607 = vmatpush3.bf16.msra.mxu1 %v2704_v1 }
 0x5c4   :  { %2615 = vmatpush3.bf16.msra.mxu0 %v2706_v59 }
 0x5c5   :  { %2609 = vmatmul.mubr.msk.bf16.vlgmr.msra.gmra.mrb[28].mxu1 %vm939_vm11, %v2079_v5 }
 0x690   :  { %v2010_v6 = vpop.f32.mrb[24].mxu1 }
 0x691   :  { %v2066_v10 = vpop.f32.mrb[12].mxu0  ;;  %v2594_v11 = vpop.f32.mrb[25].mxu1 }
 0x692   :  { %v2067_v4 = vadd.f32 %v2066_v10, %v2010_v6  ;;  %v2602_v12 = vpop.f32.mrb[13].mxu0  ;;  %v2013_v13 = vpop.f32.mrb[26].mxu1 }
 0x693   :  { %v2069_v15 = vpop.f32.mrb[14].mxu0  ;;  %v2595_v19 = vpop.f32.mrb[27].mxu1 }
 0x694   :  { %v2070_v18 = vadd.f32 %v2069_v15, %v2013_v13  ;;  %v2603_v20 = vpop.f32.mrb[15].mxu0 }
 0x698   :  { %v2129_v25 = vpop.f32.mrb[28].mxu1 }
 0x699   :  { %v2136_v22 = vadd.f32 %v2129_v25, %v2067_v4  ;;  %v2610_v23 = vpop.f32.mrb[29].mxu1 }
 0x69a   :  { %v2132_v9 = vpop.f32.mrb[30].mxu1 }
 0x69b   :  { %v2143_v24 = vadd.f32 %v2376_v21, %v2136_v22  ;;  %v2137_v26 = vadd.f32 %v2132_v9, %v2070_v18  ;;  %v2611_v27 = vpop.f32.mrb[31].mxu1  ;;  %v2377_v22 = vld [vmem:[%s3332_s2 + $0x7] ss:$0 sm:$0xff] }
 0x69d   :  { %v2145_v8 = vsel %vm939_vm11, %v2143_v24, 0.0  ;;  %v2161_v2 = vmul.f32 %v2143_v24, %v2143_v24  ;;  %v2144_v28 = vadd.f32 %v2376_v21, %v2137_v26 }
 0x69e   :  { %v2146_v30 = vrot.slane %v2145_v8, 4 }
 0x69f   :  { %v2163_v31 = vsel %vm939_vm11, %v2161_v2, 0.0  ;;  %v2152_v53 = vsel %vm939_vm11, %v2144_v28, 0.0  ;;  %v2162_v48 = vmul.f32 %v2144_v28, %v2144_v28 }
 0x6a0   :  { %v2147_v45 = vadd.f32 %v2146_v30, %v2145_v8  ;;  %v2164_v0 = vrot.slane %v2163_v31, 4  ;;  %v2153_v14 = vrot.slane %v2152_v53, 4 }
 0x6a1   :  { %v2170_v52 = vsel %vm939_vm11, %v2162_v48, 0.0 }
 0x6a2   :  { %v2148_v32 = vrot.slane %v2147_v45, 2  ;;  %v2165_v33 = vadd.f32 %v2164_v0, %v2163_v31  ;;  %v2154_v58 = vadd.f32 %v2153_v14, %v2152_v53  ;;  %v2171_v34 = vrot.slane %v2170_v52, 4 }
 0x6a4   :  { %v2149_v36 = vadd.f32 %v2148_v32, %v2147_v45  ;;  %v2166_v37 = vrot.slane %v2165_v33, 2  ;;  %v2155_v16 = vrot.slane %v2154_v58, 2  ;;  %v2172_v7 = vadd.f32 %v2171_v34, %v2170_v52 }
 0x6a6   :  { %v2150_v39 = vrot.slane %v2149_v36, 1  ;;  %v2167_v40 = vadd.f32 %v2166_v37, %v2165_v33  ;;  %v2156_v41 = vadd.f32 %v2155_v16, %v2154_v58  ;;  %v2173_v42 = vrot.slane %v2172_v7, 2 }
 0x6a8   :  { %v2151_v17 = vadd.f32 %v2150_v39, %v2149_v36  ;;  %v2168_v46 = vrot.slane %v2167_v40, 1  ;;  %v2157_v44 = vrot.slane %v2156_v41, 1  ;;  %v2174_v56 = vadd.f32 %v2173_v42, %v2172_v7 }
 0x6aa   :  { %v2159_v38 = vmul.f32 0.125, %v2151_v17  ;;  %v2169_v49 = vadd.f32 %v2168_v46, %v2167_v40  ;;  %v2158_v50 = vadd.f32 %v2157_v44, %v2156_v41  ;;  %v2175_v43 = vrot.slane %v2174_v56, 1 }
 0x6ac   :  { %v2177_v51 = vmul.f32 0.125, %v2169_v49  ;;  %v2179_v55 = vmul.f32 %v2159_v38, %v2159_v38  ;;  %v2160_v57 = vmul.f32 0.125, %v2158_v50  ;;  %v2176_v60 = vadd.f32 %v2175_v43, %v2174_v56 }
 0x6ad   :  { %v2185_v59 = vsub.f32 %v2143_v24, %v2159_v38 }
 0x6ae   :  { %v2181_v61 = vsub.f32 %v2177_v51, %v2179_v55  ;;  %v2180_v62 = vmul.f32 %v2160_v57, %v2160_v57  ;;  %v2178_v63 = vmul.f32 0.125, %v2176_v60  ;;  %v2186_v4 = vsub.f32 %v2144_v28, %v2160_v57 }
 0x6b0   :  { %v2183_v1 = vmax.f32 %v2181_v61, 0.0  ;;  %v2182_v3 = vsub.f32 %v2178_v63, %v2180_v62 }
 0x6b2   :  { %v2187_v35 = vadd.f32 1e-05, %v2183_v1  ;;  %v2184_v5 = vmax.f32 %v2182_v3, 0.0 }
 0x6b4   :  { %2723 = vrsqrt.f32 %v2187_v35  ;;  %v2188_v47 = vadd.f32 1e-05, %v2184_v5 }
 0x6b6   :  { %2725 = vrsqrt.f32 %v2188_v47 }
 0x6be   :  { %v2724_v6 = vpop.eup %2723 }
 0x6bf   :  { %v2191_v10 = vmul.f32 %v2724_v6, %v2185_v59 }
 0x6c0   :  { %v2726_v11 = vpop.eup %2725 }
 0x6c1   :  { %vm2193_vm12 = vcmp.ge.f32.partialorder %v2191_v10, 0.0  ;;  %v2195_v12 = vmul.f32 0.01, %v2191_v10  ;;  %v2192_v13 = vmul.f32 %v2726_v11, %v2186_v4 }
 0x6c3   :  { %v2197_v15 = vsel %vm2193_vm12, %v2191_v10, %v2195_v12  ;;  %vm2194_vm13 = vcmp.ge.f32.partialorder %v2192_v13, 0.0  ;;  %v2196_v18 = vmul.f32 0.01, %v2192_v13 }
 0x6c4   :  { %v2199_v20 = vadd.f32 %v2197_v15, %v3252_v29 }
 0x6c5   :  { %v2198_v19 = vsel %vm2194_vm13, %v2192_v13, %v2196_v18 }
 0x6c6   :  { %v2200_v25 = vadd.f32 %v2198_v19, %v3260_v54 }
 0x6c8   :  { %v2201_v21 = vpack.c.bf16 %v2200_v25, %v2199_v20 }
 0x6ca   :  { %2617 = vmatmul.mubr.msk.bf16.vlgmr.msra.gmra.mrb[16].mxu0 %vm939_vm11, %v2201_v21 }
 0x79d   :  { %v2260_v23 = vpop.f32.mrb[16].mxu0 }
 0x79e   :  { %v2261_v9 = vadd.f32 %v2377_v22, %v2260_v23  ;;  %v2618_v24 = vpop.f32.mrb[17].mxu0 }
 0x79f   :  { %v2263_v26 = vpop.f32.mrb[18].mxu0 }
 0x7a0   :  { %2267 = vst [vmem:[#allocation6] sm:$0xff] %v2261_v9  ;;  %v2264_v27 = vadd.f32 %v2377_v22, %v2263_v26  ;;  %v2619_v8 = vpop.f32.mrb[19].mxu0 }
 0x7a2   :  { %2268 = vst [vmem:[#allocation6 + $0x8] sm:$0xff] %v2264_v27 }
 0x7a3   :  { %2760 = shalt.err (!%p2757_p12)
}
 0x7a4   :  { %s2761_s23 = scalar_lea.hbm %s3333_s3, 256 }
 0x7a5   :  { %p2762_p13 = scmp.ne.s32.totalorder %s3333_s3, %s2761_s23  ;;  %p2765_p0 = scmp.lt.u32.totalorder %s2761_s23, %s3333_s3 }
 0x7a7   :  { %p2767_p1 = pnand %p2765_p0, %p2762_p13 }
 0x7a9   :  { %2770 = shalt.err (!%p2767_p1)
}
 0x7aa   :  { %s2781_s28 = smov 128   ;;  %s2782_s29 = smov 8  }
 0x7ab   :  { %2280 = dma.vmem_to_hbm [thread:$0]  %s2275_s20, 256, %s3333_s3, [#allocation5], %s2781_s28, %s2781_s28, %s2782_s29  }
 0x7ac   :  { %2773 = dma.done.wait [#allocation5], 256  }
 0x7ad   :  { %2774 = vsyncadd [#allocation5], 4294967040 }
 0x7ae   :  { %2284 = vsyncpa [#allocation4], 1 }
 0x7af   :  { %2285 = vsyncpa [#allocation5], 1 }

</bundles_post_ra>
